<compile_context>
chip_gen: v6e
topology: v6e:2x2x1
jax: 0.10.0
libtpu: 0.0.40
codegen_flags: <defaults>
</compile_context>

<pallas_src>
import functools

import jax
import jax.numpy as jnp
from jax import lax
from jax.experimental import pallas as pl
from jax.experimental.pallas import tpu as pltpu


_MIN_LANES = 128    # lane-dense padding width for hidden / output channels
_BIG = 3.0e38       # sentinel that sorts above every real (finite) activation


def _next_pow2(x):
    p = 1
    while p < x:
        p *= 2
    return p


def _bitonic_sort_segments(x, sort_width):
    """Ascending bitonic sort of every aligned `sort_width`-lane segment of each
    row of `x` (lane axis).  `sort_width` is a power of two dividing the lane
    count.  Partner lanes (m ^ j, j < sort_width) never leave their segment, so
    a full-width pltpu.roll (XLU slot) + per-lane selects (VPU) implement each
    compare-exchange pass."""
    lanes = x.shape[-1]
    lane = lax.broadcasted_iota(jnp.int32, (1, lanes), 1)   # masks broadcast over rows
    k = 2
    while k <= sort_width:
        j = k // 2
        while j >= 1:
            fwd = pltpu.roll(x, shift=lanes - j, axis=1)    # fwd[m] = x[(m + j) % lanes]
            bwd = pltpu.roll(x, shift=j, axis=1)            # bwd[m] = x[(m - j) % lanes]
            is_lower = (lane & j) == 0                      # m is the low lane of its pair
            take_min = is_lower == ((lane & k) == 0)        # bitonic block direction
            partner = jnp.where(is_lower, fwd, bwd)
            x = jnp.where(take_min, jnp.minimum(x, partner), jnp.maximum(x, partner))
            j //= 2
        k *= 2
    return x


def _fused_kernel(use_edge_weights, adj_ref, x_ref, w1_ref, b1_ref, w2_ref,
                  b2_ref, w3_ref, b3_ref, out_ref):
    """Per-mesh: normalize adjacency -> 2x GraphConv+ReLU -> SortPooling -> Linear."""
    f32 = jnp.float32
    n = adj_ref.shape[0]
    hidden = w1_ref.shape[1]
    lanes = w2_ref.shape[1]          # lane-dense padded hidden width (>= 128)
    pool_k = w3_ref.shape[0]
    sort_width = _next_pow2(hidden)  # 15 passes at hidden=32 instead of 28

    adj = adj_ref[...]
    if not use_edge_weights:
        adj = (adj > 0).astype(f32)

    # ---- DGL GraphConv(norm='both'): D^-1/2 A D^-1/2 -------------------------
    # Row degrees via a lane reduce, column degrees via a sublane reduce (equal
    # for the symmetric mesh graph) -- no transposes, no MXU broadcasts.
    deg_r = jnp.sum(adj, axis=1, keepdims=True)              # (n, 1)
    deg_c = jnp.sum(adj, axis=0, keepdims=True)              # (1, n)
    dinv_r = jnp.where(deg_r > 0, lax.rsqrt(deg_r), 0.0)
    dinv_c = jnp.where(deg_c > 0, lax.rsqrt(deg_c), 0.0)
    anorm = dinv_r * adj * dinv_c                            # (n, n)

    # ---- 2x GraphConv + ReLU (MXU) -------------------------------------------
    # Layer-2 weight/bias are zero-padded to `lanes`, so h2 is lane-dense and
    # its pad lanes are exactly 0 after ReLU.
    h1 = jnp.dot(anorm,
                 jnp.dot(x_ref[...], w1_ref[...], preferred_element_type=f32),
                 preferred_element_type=f32) + b1_ref[...]
    h1 = jnp.maximum(h1, 0.0)
    h2 = jnp.dot(anorm,
                 jnp.dot(h1, w2_ref[...], preferred_element_type=f32),
                 preferred_element_type=f32) + b2_ref[...]
    h2 = jnp.maximum(h2, 0.0)                                # (n, lanes)

    # ---- SortPooling(k=pool_k) ------------------------------------------------
    lane = lax.broadcasted_iota(jnp.int32, (1, lanes), 1)
    real = lane < hidden
    # (a) per-node ascending sort of the `hidden` real channels; pad lanes carry
    #     a huge sentinel so the real channels land, sorted, in lanes [0, hidden).
    h_sorted = _bitonic_sort_segments(jnp.where(real, h2, _BIG), sort_width)
    h_sorted = jnp.where(real, h_sorted, 0.0)                # (n, lanes)

    # (b) node keys = per-node max channel.  h2's pad lanes are exactly zero and
    #     activations are >= 0, so an unmasked lane max equals the last real
    #     sorted channel (what SortPooling ranks nodes by).
    keys = jnp.max(h2, axis=-1, keepdims=True)               # (n, 1)
    # Exact (n,1)->(1,n) "transpose" of keys: diagonal select + sublane max.
    row_i = lax.broadcasted_iota(jnp.int32, (n, n), 0)
    col_j = lax.broadcasted_iota(jnp.int32, (n, n), 1)
    keys_row = jnp.max(jnp.where(row_i == col_j, keys, -_BIG),
                       axis=0, keepdims=True)                # (1, n), bit-exact copy
    # beats[i, j] = node i ranks before node j (descending key, index tie-break).
    beats = (keys > keys_row) | ((keys == keys_row) & (row_i < col_j))
    rank = jnp.sum(beats.astype(f32), axis=0, keepdims=True)  # (1, n), exact ints

    # (c) top-k selection as a one-hot matmul: sel[r, i] = (rank[i] == r).
    r_iota = lax.broadcasted_iota(jnp.int32, (pool_k, n), 0).astype(f32)
    sel = (jnp.abs(rank - r_iota) < 0.5).astype(f32)          # (pool_k, n)
    pooled = jnp.dot(sel, h_sorted, preferred_element_type=f32)  # (pool_k, lanes)

    # ---- Dropout (eval -> identity) + Linear(pool_k*hidden -> out_pad) --------
    # flatten(pooled) @ W3 == sum_r pooled[r] @ W3[r]; W3 was pre-reshaped and
    # zero-padded to (pool_k, lanes, out_pad).  Static unroll (see header note).
    acc = b3_ref[...]                                         # (1, out_pad)
    for r in range(pool_k):
        acc = acc + jnp.dot(pooled[r:r + 1, :], w3_ref[r],
                            preferred_element_type=f32)
    out_ref[...] = acc                                        # lane-dense store


def prepare_params(params, pool_dim):
    """One-time parameter prep (outside the hot path): cast to f32, zero-pad the
    hidden axis to the lane-dense width, pad the output axis to a full 128-lane
    row, and pre-split W3 into per-rank (lanes, out_pad) blocks."""
    hidden = params["w1"].shape[1]
    out_feats = params["w3"].shape[1]
    assert params["w3"].shape[0] == pool_dim * hidden
    lanes = max(_MIN_LANES, _next_pow2(hidden))
    out_pad = max(_MIN_LANES, _next_pow2(out_feats))

    w2p = jnp.zeros((hidden, lanes), jnp.float32).at[:, :hidden].set(
        params["w2"].astype(jnp.float32))
    b2p = jnp.zeros((1, lanes), jnp.float32).at[:, :hidden].set(
        params["b2"].astype(jnp.float32).reshape(1, hidden))
    w3p = jnp.zeros((pool_dim, lanes, out_pad), jnp.float32).at[:, :hidden, :out_feats].set(
        params["w3"].astype(jnp.float32).reshape(pool_dim, hidden, out_feats))
    b3p = jnp.zeros((1, out_pad), jnp.float32).at[:, :out_feats].set(
        params["b3"].astype(jnp.float32).reshape(1, out_feats))
    return {
        "w1": params["w1"].astype(jnp.float32),
        "b1": params["b1"].astype(jnp.float32).reshape(1, hidden),
        "w2p": w2p, "b2p": b2p, "w3p": w3p, "b3p": b3p,
    }


@functools.partial(jax.jit,
                   static_argnames=("readout_dim", "out_feats",
                                    "mesh_graph_edge_weights"))
def mesh_network_srpr_forward(patches, adj_weights, prep, readout_dim, out_feats,
                              mesh_graph_edge_weights=True):
    """MeshNetworkSRPR forward.

    patches:     (N, P, F) or (B, N, P, F) spider-patch 'aggregated_feats'
    adj_weights: (N, N)    or (B, N, N)    dense mesh-graph edge weights (0 = no edge)
    Returns (1, out_feats) for a single mesh (module semantics) or (B, out_feats).
    """
    single = adj_weights.ndim == 2
    if single:
        adj_weights = adj_weights[None]
        patches = patches[None]
    b, n = adj_weights.shape[0], adj_weights.shape[1]

    # SpiralReadout: the GraphDataLoader/vstack loop of the reference collapses
    # to one reshape per mesh.
    readouts = patches.reshape(b, n, readout_dim).astype(jnp.float32)
    adj = adj_weights.astype(jnp.float32)

    hidden = prep["w1"].shape[1]
    lanes = prep["w2p"].shape[1]
    pool_k = prep["w3p"].shape[0]
    out_pad = prep["b3p"].shape[1]

    kernel = functools.partial(_fused_kernel, mesh_graph_edge_weights)
    const2 = lambda i: (0, 0)
    const3 = lambda i: (0, 0, 0)

    out = pl.pallas_call(
        kernel,
        out_shape=jax.ShapeDtypeStruct((b, 1, out_pad), jnp.float32),
        grid=(b,),
        in_specs=[
            pl.BlockSpec((None, n, n), lambda i: (i, 0, 0)),             # adjacency (per mesh)
            pl.BlockSpec((None, n, readout_dim), lambda i: (i, 0, 0)),   # readouts (per mesh)
            pl.BlockSpec((readout_dim, hidden), const2),                 # w1  (VMEM-resident)
            pl.BlockSpec((1, hidden), const2),                           # b1
            pl.BlockSpec((hidden, lanes), const2),                       # w2 (padded)
            pl.BlockSpec((1, lanes), const2),                            # b2 (padded)
            pl.BlockSpec((pool_k, lanes, out_pad), const3),              # w3 (padded)
            pl.BlockSpec((1, out_pad), const2),                          # b3 (padded)
        ],
        out_specs=pl.BlockSpec((None, 1, out_pad), lambda i: (i, 0, 0)),
        compiler_params=pltpu.CompilerParams(
            dimension_semantics=("parallel",),
            vmem_limit_bytes=32 * 1024 * 1024),
    )(adj, readouts, prep["w1"], prep["b1"], prep["w2p"], prep["b2p"],
      prep["w3p"], prep["b3p"])

    return out.reshape(b, out_pad)[:, :out_feats]


# ---------------------------------------------------------------------------
# Pure-JAX reference (same reconstructed semantics) for validation.
# ---------------------------------------------------------------------------
def _reference_forward(patches, adj_weights, params, readout_dim, pool_dim,
                       mesh_graph_edge_weights=True):
    hp = lax.Precision.HIGHEST
    n = adj_weights.shape[0]
    x = patches.reshape(n, readout_dim).astype(jnp.float32)
    a = adj_weights.astype(jnp.float32)
    if not mesh_graph_edge_weights:
        a = (a > 0).astype(jnp.float32)
    deg = a.sum(axis=1)
    dinv = jnp.where(deg > 0, 1.0 / jnp.sqrt(deg), 0.0)
    anorm = dinv[:, None] * a * dinv[None, :]
    h1 = jnp.maximum(
        jnp.dot(anorm, jnp.dot(x, params["w1"], precision=hp), precision=hp)
        + params["b1"], 0.0)
    h2 = jnp.maximum(
        jnp.dot(anorm, jnp.dot(h1, params["w2"], precision=hp), precision=hp)
        + params["b2"], 0.0)
    h_sorted = jnp.sort(h2, axis=-1)
    keys = h_sorted[:, -1]
    order = jnp.argsort(-keys)
    pooled = h_sorted[order[:pool_dim]].reshape(1, -1)
    return jnp.dot(pooled, params["w3"], precision=hp) + params["b3"]


# ---------------------------------------------------------------------------
# Main
# ---------------------------------------------------------------------------
if __name__ == "__main__":
    key = jax.random.PRNGKey(0)

    N_MESH = 16                      # mesh-graph nodes (one spider patch per node)
    P_NODES, F_FEAT = 8, 4
    READOUT_DIM = P_NODES * F_FEAT   # 32
    HIDDEN_DIM = 32
    OUT_FEATS = 4
    POOL_DIM = 10
    BATCH = 4

    (k_patch, k_adj, k_w1, k_b1, k_w2, k_b2, k_w3, k_b3,
     k_pb, k_ab) = jax.random.split(key, 10)

    def make_adj(k, batch_shape=()):
        raw = jax.random.uniform(k, batch_shape + (N_MESH, N_MESH), jnp.float32)
        a = (raw > 0.6).astype(jnp.float32) * raw
        a = jnp.maximum(a, jnp.swapaxes(a, -1, -2))          # symmetric
        return a * (1.0 - jnp.eye(N_MESH, dtype=jnp.float32))  # no self loops

    # Spider patches: per mesh node, P_NODES nodes x F_FEAT 'aggregated_feats'.
    patches = jax.random.normal(k_patch, (N_MESH, P_NODES, F_FEAT), jnp.float32)
    adj = make_adj(k_adj)

    def glorot(k, shape):
        fan_in, fan_out = shape
        lim = (6.0 / (fan_in + fan_out)) ** 0.5
        return jax.random.uniform(k, shape, jnp.float32, -lim, lim)

    params = {
        "w1": glorot(k_w1, (READOUT_DIM, HIDDEN_DIM)),
        "b1": 0.01 * jax.random.normal(k_b1, (1, HIDDEN_DIM), jnp.float32),
        "w2": glorot(k_w2, (HIDDEN_DIM, HIDDEN_DIM)),
        "b2": 0.01 * jax.random.normal(k_b2, (1, HIDDEN_DIM), jnp.float32),
        "w3": glorot(k_w3, (POOL_DIM * HIDDEN_DIM, OUT_FEATS)),
        "b3": 0.01 * jax.random.normal(k_b3, (1, OUT_FEATS), jnp.float32),
    }
    prep = prepare_params(params, POOL_DIM)   # one-time padding / reshape

    # --- single mesh (module forward semantics, B == 1) ----------------------
    out = mesh_network_srpr_forward(
        patches, adj, prep, readout_dim=READOUT_DIM, out_feats=OUT_FEATS,
        mesh_graph_edge_weights=True)
    out = jax.block_until_ready(out)
    ref = _reference_forward(patches, adj, params, READOUT_DIM, POOL_DIM, True)
    ref = jax.block_until_ready(ref)
    assert out.shape == (1, OUT_FEATS)
    assert bool(jnp.all(jnp.isfinite(out)))
    assert bool(jnp.allclose(out, ref, rtol=2e-3, atol=2e-3)), (out, ref)

    # --- batched meshes (throughput path: grid=(B,), "parallel") -------------
    patches_b = jax.random.normal(k_pb, (BATCH, N_MESH, P_NODES, F_FEAT), jnp.float32)
    adj_b = make_adj(k_ab, (BATCH,))
    out_b = mesh_network_srpr_forward(
        patches_b, adj_b, prep, readout_dim=READOUT_DIM, out_feats=OUT_FEATS,
        mesh_graph_edge_weights=True)
    out_b = jax.block_until_ready(out_b)
    ref_b = jnp.stack([
        _reference_forward(patches_b[i], adj_b[i], params, READOUT_DIM,
                           POOL_DIM, True)[0]
        for i in range(BATCH)])
    assert out_b.shape == (BATCH, OUT_FEATS)
    assert bool(jnp.all(jnp.isfinite(out_b)))
    assert bool(jnp.allclose(out_b, ref_b, rtol=2e-3, atol=2e-3)), (out_b, ref_b)

    print("KERNEL_OK")
</pallas_src>

<mosaic_0001>
module attributes {stable_mosaic.version = 11 : i64} {
  func.func @_fused_kernel(%arg0: i32, %arg1: memref<1x16x16xf32, #tpu.memory_space<vmem>>, %arg2: memref<1x16x32xf32, #tpu.memory_space<vmem>>, %arg3: memref<32x32xf32, #tpu.memory_space<vmem>>, %arg4: memref<1x32xf32, #tpu.memory_space<vmem>>, %arg5: memref<32x128xf32, #tpu.memory_space<vmem>>, %arg6: memref<1x128xf32, #tpu.memory_space<vmem>>, %arg7: memref<10x128x128xf32, #tpu.memory_space<vmem>>, %arg8: memref<1x128xf32, #tpu.memory_space<vmem>>, %arg9: memref<1x1x128xf32, #tpu.memory_space<vmem>>) attributes {dimension_semantics = [#tpu.dimension_semantics<parallel>], iteration_bounds = array<i64: 1>, scalar_prefetch = 0 : i64, scratch_operands = 0 : i64, tpu.core_type = #tpu.core_type<tc>, window_params = [{transform_indices = @transform_0, window_bounds = array<i64: 1, 16, 16>}, {transform_indices = @transform_1, window_bounds = array<i64: 1, 16, 32>}, {pipeline_mode = #tpu.pipeline_mode<synchronous>, transform_indices = @transform_2, window_bounds = array<i64: 32, 32>}, {pipeline_mode = #tpu.pipeline_mode<synchronous>, transform_indices = @transform_3, window_bounds = array<i64: 1, 32>}, {pipeline_mode = #tpu.pipeline_mode<synchronous>, transform_indices = @transform_4, window_bounds = array<i64: 32, 128>}, {pipeline_mode = #tpu.pipeline_mode<synchronous>, transform_indices = @transform_5, window_bounds = array<i64: 1, 128>}, {pipeline_mode = #tpu.pipeline_mode<synchronous>, transform_indices = @transform_6, window_bounds = array<i64: 10, 128, 128>}, {pipeline_mode = #tpu.pipeline_mode<synchronous>, transform_indices = @transform_7, window_bounds = array<i64: 1, 128>}, {transform_indices = @transform_8, window_bounds = array<i64: 1, 1, 128>}]} {
    %c0 = arith.constant 0 : index
    %c0_0 = arith.constant 0 : index
    %c0_1 = arith.constant 0 : index
    %0 = vector.load %arg1[%c0, %c0_0, %c0_1] : memref<1x16x16xf32, #tpu.memory_space<vmem>>, vector<1x16x16xf32>
    %1 = vector.shape_cast %0 : vector<1x16x16xf32> to vector<16x16xf32>
    %cst = arith.constant dense<0.000000e+00> : vector<16xf32>
    %2 = vector.multi_reduction <add>, %1, %cst [1] : vector<16x16xf32> to vector<16xf32>
    %3 = vector.shape_cast %2 : vector<16xf32> to vector<16x1xf32>
    %cst_2 = arith.constant dense<0.000000e+00> : vector<16xf32>
    %4 = vector.multi_reduction <add>, %1, %cst_2 [0] : vector<16x16xf32> to vector<16xf32>
    %5 = vector.shape_cast %4 : vector<16xf32> to vector<1x16xf32>
    %cst_3 = arith.constant 0.000000e+00 : f32
    %6 = vector.broadcast %cst_3 : f32 to vector<16x1xf32>
    %7 = arith.cmpf ogt, %3, %6 : vector<16x1xf32>
    %8 = math.rsqrt %3 : vector<16x1xf32>
    %cst_4 = arith.constant 0.000000e+00 : f32
    %9 = vector.broadcast %cst_4 : f32 to vector<16x1xf32>
    %10 = arith.select %7, %8, %9 : vector<16x1xi1>, vector<16x1xf32>
    %cst_5 = arith.constant 0.000000e+00 : f32
    %11 = vector.broadcast %cst_5 : f32 to vector<1x16xf32>
    %12 = arith.cmpf ogt, %5, %11 : vector<1x16xf32>
    %13 = math.rsqrt %5 : vector<1x16xf32>
    %cst_6 = arith.constant 0.000000e+00 : f32
    %14 = vector.broadcast %cst_6 : f32 to vector<1x16xf32>
    %15 = arith.select %12, %13, %14 : vector<1x16xi1>, vector<1x16xf32>
    %16 = vector.broadcast %10 : vector<16x1xf32> to vector<16x16xf32>
    %17 = arith.mulf %16, %1 : vector<16x16xf32>
    %18 = vector.broadcast %15 : vector<1x16xf32> to vector<16x16xf32>
    %19 = arith.mulf %17, %18 : vector<16x16xf32>
    %c0_7 = arith.constant 0 : index
    %c0_8 = arith.constant 0 : index
    %c0_9 = arith.constant 0 : index
    %20 = vector.load %arg2[%c0_7, %c0_8, %c0_9] : memref<1x16x32xf32, #tpu.memory_space<vmem>>, vector<1x16x32xf32>
    %21 = vector.shape_cast %20 : vector<1x16x32xf32> to vector<16x32xf32>
    %c0_10 = arith.constant 0 : index
    %c0_11 = arith.constant 0 : index
    %22 = vector.load %arg3[%c0_10, %c0_11] : memref<32x32xf32, #tpu.memory_space<vmem>>, vector<32x32xf32>
    %cst_12 = arith.constant dense<0.000000e+00> : vector<16x32xf32>
    %23 = tpu.matmul %21, %22, %cst_12 {dimension_numbers = #tpu.dot_dimension_numbers<[1], [0], [0], [1], [0, 0, 1, 1], [], []>} : vector<16x32xf32>, vector<32x32xf32>, vector<16x32xf32> -> vector<16x32xf32>
    %cst_13 = arith.constant dense<0.000000e+00> : vector<16x32xf32>
    %24 = tpu.matmul %19, %23, %cst_13 {dimension_numbers = #tpu.dot_dimension_numbers<[1], [0], [0], [1], [0, 0, 1, 1], [], []>} : vector<16x16xf32>, vector<16x32xf32>, vector<16x32xf32> -> vector<16x32xf32>
    %c0_14 = arith.constant 0 : index
    %c0_15 = arith.constant 0 : index
    %25 = vector.load %arg4[%c0_14, %c0_15] : memref<1x32xf32, #tpu.memory_space<vmem>>, vector<1x32xf32>
    %26 = vector.broadcast %25 : vector<1x32xf32> to vector<16x32xf32>
    %27 = arith.addf %24, %26 : vector<16x32xf32>
    %cst_16 = arith.constant 0.000000e+00 : f32
    %28 = vector.broadcast %cst_16 : f32 to vector<16x32xf32>
    %29 = arith.maximumf %27, %28 : vector<16x32xf32>
    %c0_17 = arith.constant 0 : index
    %c0_18 = arith.constant 0 : index
    %30 = vector.load %arg5[%c0_17, %c0_18] : memref<32x128xf32, #tpu.memory_space<vmem>>, vector<32x128xf32>
    %cst_19 = arith.constant dense<0.000000e+00> : vector<16x128xf32>
    %31 = tpu.matmul %29, %30, %cst_19 {dimension_numbers = #tpu.dot_dimension_numbers<[1], [0], [0], [1], [0, 0, 1, 1], [], []>} : vector<16x32xf32>, vector<32x128xf32>, vector<16x128xf32> -> vector<16x128xf32>
    %cst_20 = arith.constant dense<0.000000e+00> : vector<16x128xf32>
    %32 = tpu.matmul %19, %31, %cst_20 {dimension_numbers = #tpu.dot_dimension_numbers<[1], [0], [0], [1], [0, 0, 1, 1], [], []>} : vector<16x16xf32>, vector<16x128xf32>, vector<16x128xf32> -> vector<16x128xf32>
    %c0_21 = arith.constant 0 : index
    %c0_22 = arith.constant 0 : index
    %33 = vector.load %arg6[%c0_21, %c0_22] : memref<1x128xf32, #tpu.memory_space<vmem>>, vector<1x128xf32>
    %34 = vector.broadcast %33 : vector<1x128xf32> to vector<16x128xf32>
    %35 = arith.addf %32, %34 : vector<16x128xf32>
    %cst_23 = arith.constant 0.000000e+00 : f32
    %36 = vector.broadcast %cst_23 : f32 to vector<16x128xf32>
    %37 = arith.maximumf %35, %36 : vector<16x128xf32>
    %38 = tpu.iota {dimensions = array<i32: 1>} : vector<1x128xi32>
    %c32_i32 = arith.constant 32 : i32
    %39 = vector.broadcast %c32_i32 : i32 to vector<1x128xi32>
    %40 = arith.cmpi slt, %38, %39 : vector<1x128xi32>
    %cst_24 = arith.constant 3.000000e+38 : f32
    %41 = vector.shape_cast %40 : vector<1x128xi1> to vector<1x128xi1>
    %42 = vector.broadcast %41 : vector<1x128xi1> to vector<16x128xi1>
    %43 = vector.broadcast %cst_24 : f32 to vector<16x128xf32>
    %44 = arith.select %42, %37, %43 : vector<16x128xi1>, vector<16x128xf32>
    %45 = tpu.iota {dimensions = array<i32: 1>} : vector<1x128xi32>
    %c127_i32 = arith.constant 127 : i32
    %46 = tpu.dynamic_rotate %44 by %c127_i32 dim 1 : vector<16x128xf32>, i32 -> vector<16x128xf32>
    %c1_i32 = arith.constant 1 : i32
    %47 = tpu.dynamic_rotate %44 by %c1_i32 dim 1 : vector<16x128xf32>, i32 -> vector<16x128xf32>
    %c1_i32_25 = arith.constant 1 : i32
    %48 = vector.broadcast %c1_i32_25 : i32 to vector<1x128xi32>
    %49 = arith.andi %45, %48 : vector<1x128xi32>
    %c0_i32 = arith.constant 0 : i32
    %50 = vector.broadcast %c0_i32 : i32 to vector<1x128xi32>
    %51 = arith.cmpi eq, %49, %50 : vector<1x128xi32>
    %c2_i32 = arith.constant 2 : i32
    %52 = vector.broadcast %c2_i32 : i32 to vector<1x128xi32>
    %53 = arith.andi %45, %52 : vector<1x128xi32>
    %c0_i32_26 = arith.constant 0 : i32
    %54 = vector.broadcast %c0_i32_26 : i32 to vector<1x128xi32>
    %55 = arith.cmpi eq, %53, %54 : vector<1x128xi32>
    %56 = arith.xori %51, %55 : vector<1x128xi1>
    %cst_27 = arith.constant dense<true> : vector<1x128xi1>
    %57 = arith.xori %56, %cst_27 : vector<1x128xi1>
    %58 = vector.shape_cast %51 : vector<1x128xi1> to vector<1x128xi1>
    %59 = vector.broadcast %58 : vector<1x128xi1> to vector<16x128xi1>
    %60 = arith.select %59, %46, %47 : vector<16x128xi1>, vector<16x128xf32>
    %61 = arith.minimumf %44, %60 : vector<16x128xf32>
    %62 = arith.maximumf %44, %60 : vector<16x128xf32>
    %63 = vector.shape_cast %57 : vector<1x128xi1> to vector<1x128xi1>
    %64 = vector.broadcast %63 : vector<1x128xi1> to vector<16x128xi1>
    %65 = arith.select %64, %61, %62 : vector<16x128xi1>, vector<16x128xf32>
    %c126_i32 = arith.constant 126 : i32
    %66 = tpu.dynamic_rotate %65 by %c126_i32 dim 1 : vector<16x128xf32>, i32 -> vector<16x128xf32>
    %c2_i32_28 = arith.constant 2 : i32
    %67 = tpu.dynamic_rotate %65 by %c2_i32_28 dim 1 : vector<16x128xf32>, i32 -> vector<16x128xf32>
    %c2_i32_29 = arith.constant 2 : i32
    %68 = vector.broadcast %c2_i32_29 : i32 to vector<1x128xi32>
    %69 = arith.andi %45, %68 : vector<1x128xi32>
    %c0_i32_30 = arith.constant 0 : i32
    %70 = vector.broadcast %c0_i32_30 : i32 to vector<1x128xi32>
    %71 = arith.cmpi eq, %69, %70 : vector<1x128xi32>
    %c4_i32 = arith.constant 4 : i32
    %72 = vector.broadcast %c4_i32 : i32 to vector<1x128xi32>
    %73 = arith.andi %45, %72 : vector<1x128xi32>
    %c0_i32_31 = arith.constant 0 : i32
    %74 = vector.broadcast %c0_i32_31 : i32 to vector<1x128xi32>
    %75 = arith.cmpi eq, %73, %74 : vector<1x128xi32>
    %76 = arith.xori %71, %75 : vector<1x128xi1>
    %cst_32 = arith.constant dense<true> : vector<1x128xi1>
    %77 = arith.xori %76, %cst_32 : vector<1x128xi1>
    %78 = vector.shape_cast %71 : vector<1x128xi1> to vector<1x128xi1>
    %79 = vector.broadcast %78 : vector<1x128xi1> to vector<16x128xi1>
    %80 = arith.select %79, %66, %67 : vector<16x128xi1>, vector<16x128xf32>
    %81 = arith.minimumf %65, %80 : vector<16x128xf32>
    %82 = arith.maximumf %65, %80 : vector<16x128xf32>
    %83 = vector.shape_cast %77 : vector<1x128xi1> to vector<1x128xi1>
    %84 = vector.broadcast %83 : vector<1x128xi1> to vector<16x128xi1>
    %85 = arith.select %84, %81, %82 : vector<16x128xi1>, vector<16x128xf32>
    %c127_i32_33 = arith.constant 127 : i32
    %86 = tpu.dynamic_rotate %85 by %c127_i32_33 dim 1 : vector<16x128xf32>, i32 -> vector<16x128xf32>
    %c1_i32_34 = arith.constant 1 : i32
    %87 = tpu.dynamic_rotate %85 by %c1_i32_34 dim 1 : vector<16x128xf32>, i32 -> vector<16x128xf32>
    %c1_i32_35 = arith.constant 1 : i32
    %88 = vector.broadcast %c1_i32_35 : i32 to vector<1x128xi32>
    %89 = arith.andi %45, %88 : vector<1x128xi32>
    %c0_i32_36 = arith.constant 0 : i32
    %90 = vector.broadcast %c0_i32_36 : i32 to vector<1x128xi32>
    %91 = arith.cmpi eq, %89, %90 : vector<1x128xi32>
    %c4_i32_37 = arith.constant 4 : i32
    %92 = vector.broadcast %c4_i32_37 : i32 to vector<1x128xi32>
    %93 = arith.andi %45, %92 : vector<1x128xi32>
    %c0_i32_38 = arith.constant 0 : i32
    %94 = vector.broadcast %c0_i32_38 : i32 to vector<1x128xi32>
    %95 = arith.cmpi eq, %93, %94 : vector<1x128xi32>
    %96 = arith.xori %91, %95 : vector<1x128xi1>
    %cst_39 = arith.constant dense<true> : vector<1x128xi1>
    %97 = arith.xori %96, %cst_39 : vector<1x128xi1>
    %98 = vector.shape_cast %91 : vector<1x128xi1> to vector<1x128xi1>
    %99 = vector.broadcast %98 : vector<1x128xi1> to vector<16x128xi1>
    %100 = arith.select %99, %86, %87 : vector<16x128xi1>, vector<16x128xf32>
    %101 = arith.minimumf %85, %100 : vector<16x128xf32>
    %102 = arith.maximumf %85, %100 : vector<16x128xf32>
    %103 = vector.shape_cast %97 : vector<1x128xi1> to vector<1x128xi1>
    %104 = vector.broadcast %103 : vector<1x128xi1> to vector<16x128xi1>
    %105 = arith.select %104, %101, %102 : vector<16x128xi1>, vector<16x128xf32>
    %c124_i32 = arith.constant 124 : i32
    %106 = tpu.dynamic_rotate %105 by %c124_i32 dim 1 : vector<16x128xf32>, i32 -> vector<16x128xf32>
    %c4_i32_40 = arith.constant 4 : i32
    %107 = tpu.dynamic_rotate %105 by %c4_i32_40 dim 1 : vector<16x128xf32>, i32 -> vector<16x128xf32>
    %c4_i32_41 = arith.constant 4 : i32
    %108 = vector.broadcast %c4_i32_41 : i32 to vector<1x128xi32>
    %109 = arith.andi %45, %108 : vector<1x128xi32>
    %c0_i32_42 = arith.constant 0 : i32
    %110 = vector.broadcast %c0_i32_42 : i32 to vector<1x128xi32>
    %111 = arith.cmpi eq, %109, %110 : vector<1x128xi32>
    %c8_i32 = arith.constant 8 : i32
    %112 = vector.broadcast %c8_i32 : i32 to vector<1x128xi32>
    %113 = arith.andi %45, %112 : vector<1x128xi32>
    %c0_i32_43 = arith.constant 0 : i32
    %114 = vector.broadcast %c0_i32_43 : i32 to vector<1x128xi32>
    %115 = arith.cmpi eq, %113, %114 : vector<1x128xi32>
    %116 = arith.xori %111, %115 : vector<1x128xi1>
    %cst_44 = arith.constant dense<true> : vector<1x128xi1>
    %117 = arith.xori %116, %cst_44 : vector<1x128xi1>
    %118 = vector.shape_cast %111 : vector<1x128xi1> to vector<1x128xi1>
    %119 = vector.broadcast %118 : vector<1x128xi1> to vector<16x128xi1>
    %120 = arith.select %119, %106, %107 : vector<16x128xi1>, vector<16x128xf32>
    %121 = arith.minimumf %105, %120 : vector<16x128xf32>
    %122 = arith.maximumf %105, %120 : vector<16x128xf32>
    %123 = vector.shape_cast %117 : vector<1x128xi1> to vector<1x128xi1>
    %124 = vector.broadcast %123 : vector<1x128xi1> to vector<16x128xi1>
    %125 = arith.select %124, %121, %122 : vector<16x128xi1>, vector<16x128xf32>
    %c126_i32_45 = arith.constant 126 : i32
    %126 = tpu.dynamic_rotate %125 by %c126_i32_45 dim 1 : vector<16x128xf32>, i32 -> vector<16x128xf32>
    %c2_i32_46 = arith.constant 2 : i32
    %127 = tpu.dynamic_rotate %125 by %c2_i32_46 dim 1 : vector<16x128xf32>, i32 -> vector<16x128xf32>
    %c2_i32_47 = arith.constant 2 : i32
    %128 = vector.broadcast %c2_i32_47 : i32 to vector<1x128xi32>
    %129 = arith.andi %45, %128 : vector<1x128xi32>
    %c0_i32_48 = arith.constant 0 : i32
    %130 = vector.broadcast %c0_i32_48 : i32 to vector<1x128xi32>
    %131 = arith.cmpi eq, %129, %130 : vector<1x128xi32>
    %c8_i32_49 = arith.constant 8 : i32
    %132 = vector.broadcast %c8_i32_49 : i32 to vector<1x128xi32>
    %133 = arith.andi %45, %132 : vector<1x128xi32>
    %c0_i32_50 = arith.constant 0 : i32
    %134 = vector.broadcast %c0_i32_50 : i32 to vector<1x128xi32>
    %135 = arith.cmpi eq, %133, %134 : vector<1x128xi32>
    %136 = arith.xori %131, %135 : vector<1x128xi1>
    %cst_51 = arith.constant dense<true> : vector<1x128xi1>
    %137 = arith.xori %136, %cst_51 : vector<1x128xi1>
    %138 = vector.shape_cast %131 : vector<1x128xi1> to vector<1x128xi1>
    %139 = vector.broadcast %138 : vector<1x128xi1> to vector<16x128xi1>
    %140 = arith.select %139, %126, %127 : vector<16x128xi1>, vector<16x128xf32>
    %141 = arith.minimumf %125, %140 : vector<16x128xf32>
    %142 = arith.maximumf %125, %140 : vector<16x128xf32>
    %143 = vector.shape_cast %137 : vector<1x128xi1> to vector<1x128xi1>
    %144 = vector.broadcast %143 : vector<1x128xi1> to vector<16x128xi1>
    %145 = arith.select %144, %141, %142 : vector<16x128xi1>, vector<16x128xf32>
    %c127_i32_52 = arith.constant 127 : i32
    %146 = tpu.dynamic_rotate %145 by %c127_i32_52 dim 1 : vector<16x128xf32>, i32 -> vector<16x128xf32>
    %c1_i32_53 = arith.constant 1 : i32
    %147 = tpu.dynamic_rotate %145 by %c1_i32_53 dim 1 : vector<16x128xf32>, i32 -> vector<16x128xf32>
    %c1_i32_54 = arith.constant 1 : i32
    %148 = vector.broadcast %c1_i32_54 : i32 to vector<1x128xi32>
    %149 = arith.andi %45, %148 : vector<1x128xi32>
    %c0_i32_55 = arith.constant 0 : i32
    %150 = vector.broadcast %c0_i32_55 : i32 to vector<1x128xi32>
    %151 = arith.cmpi eq, %149, %150 : vector<1x128xi32>
    %c8_i32_56 = arith.constant 8 : i32
    %152 = vector.broadcast %c8_i32_56 : i32 to vector<1x128xi32>
    %153 = arith.andi %45, %152 : vector<1x128xi32>
    %c0_i32_57 = arith.constant 0 : i32
    %154 = vector.broadcast %c0_i32_57 : i32 to vector<1x128xi32>
    %155 = arith.cmpi eq, %153, %154 : vector<1x128xi32>
    %156 = arith.xori %151, %155 : vector<1x128xi1>
    %cst_58 = arith.constant dense<true> : vector<1x128xi1>
    %157 = arith.xori %156, %cst_58 : vector<1x128xi1>
    %158 = vector.shape_cast %151 : vector<1x128xi1> to vector<1x128xi1>
    %159 = vector.broadcast %158 : vector<1x128xi1> to vector<16x128xi1>
    %160 = arith.select %159, %146, %147 : vector<16x128xi1>, vector<16x128xf32>
    %161 = arith.minimumf %145, %160 : vector<16x128xf32>
    %162 = arith.maximumf %145, %160 : vector<16x128xf32>
    %163 = vector.shape_cast %157 : vector<1x128xi1> to vector<1x128xi1>
    %164 = vector.broadcast %163 : vector<1x128xi1> to vector<16x128xi1>
    %165 = arith.select %164, %161, %162 : vector<16x128xi1>, vector<16x128xf32>
    %c120_i32 = arith.constant 120 : i32
    %166 = tpu.dynamic_rotate %165 by %c120_i32 dim 1 : vector<16x128xf32>, i32 -> vector<16x128xf32>
    %c8_i32_59 = arith.constant 8 : i32
    %167 = tpu.dynamic_rotate %165 by %c8_i32_59 dim 1 : vector<16x128xf32>, i32 -> vector<16x128xf32>
    %c8_i32_60 = arith.constant 8 : i32
    %168 = vector.broadcast %c8_i32_60 : i32 to vector<1x128xi32>
    %169 = arith.andi %45, %168 : vector<1x128xi32>
    %c0_i32_61 = arith.constant 0 : i32
    %170 = vector.broadcast %c0_i32_61 : i32 to vector<1x128xi32>
    %171 = arith.cmpi eq, %169, %170 : vector<1x128xi32>
    %c16_i32 = arith.constant 16 : i32
    %172 = vector.broadcast %c16_i32 : i32 to vector<1x128xi32>
    %173 = arith.andi %45, %172 : vector<1x128xi32>
    %c0_i32_62 = arith.constant 0 : i32
    %174 = vector.broadcast %c0_i32_62 : i32 to vector<1x128xi32>
    %175 = arith.cmpi eq, %173, %174 : vector<1x128xi32>
    %176 = arith.xori %171, %175 : vector<1x128xi1>
    %cst_63 = arith.constant dense<true> : vector<1x128xi1>
    %177 = arith.xori %176, %cst_63 : vector<1x128xi1>
    %178 = vector.shape_cast %171 : vector<1x128xi1> to vector<1x128xi1>
    %179 = vector.broadcast %178 : vector<1x128xi1> to vector<16x128xi1>
    %180 = arith.select %179, %166, %167 : vector<16x128xi1>, vector<16x128xf32>
    %181 = arith.minimumf %165, %180 : vector<16x128xf32>
    %182 = arith.maximumf %165, %180 : vector<16x128xf32>
    %183 = vector.shape_cast %177 : vector<1x128xi1> to vector<1x128xi1>
    %184 = vector.broadcast %183 : vector<1x128xi1> to vector<16x128xi1>
    %185 = arith.select %184, %181, %182 : vector<16x128xi1>, vector<16x128xf32>
    %c124_i32_64 = arith.constant 124 : i32
    %186 = tpu.dynamic_rotate %185 by %c124_i32_64 dim 1 : vector<16x128xf32>, i32 -> vector<16x128xf32>
    %c4_i32_65 = arith.constant 4 : i32
    %187 = tpu.dynamic_rotate %185 by %c4_i32_65 dim 1 : vector<16x128xf32>, i32 -> vector<16x128xf32>
    %c4_i32_66 = arith.constant 4 : i32
    %188 = vector.broadcast %c4_i32_66 : i32 to vector<1x128xi32>
    %189 = arith.andi %45, %188 : vector<1x128xi32>
    %c0_i32_67 = arith.constant 0 : i32
    %190 = vector.broadcast %c0_i32_67 : i32 to vector<1x128xi32>
    %191 = arith.cmpi eq, %189, %190 : vector<1x128xi32>
    %c16_i32_68 = arith.constant 16 : i32
    %192 = vector.broadcast %c16_i32_68 : i32 to vector<1x128xi32>
    %193 = arith.andi %45, %192 : vector<1x128xi32>
    %c0_i32_69 = arith.constant 0 : i32
    %194 = vector.broadcast %c0_i32_69 : i32 to vector<1x128xi32>
    %195 = arith.cmpi eq, %193, %194 : vector<1x128xi32>
    %196 = arith.xori %191, %195 : vector<1x128xi1>
    %cst_70 = arith.constant dense<true> : vector<1x128xi1>
    %197 = arith.xori %196, %cst_70 : vector<1x128xi1>
    %198 = vector.shape_cast %191 : vector<1x128xi1> to vector<1x128xi1>
    %199 = vector.broadcast %198 : vector<1x128xi1> to vector<16x128xi1>
    %200 = arith.select %199, %186, %187 : vector<16x128xi1>, vector<16x128xf32>
    %201 = arith.minimumf %185, %200 : vector<16x128xf32>
    %202 = arith.maximumf %185, %200 : vector<16x128xf32>
    %203 = vector.shape_cast %197 : vector<1x128xi1> to vector<1x128xi1>
    %204 = vector.broadcast %203 : vector<1x128xi1> to vector<16x128xi1>
    %205 = arith.select %204, %201, %202 : vector<16x128xi1>, vector<16x128xf32>
    %c126_i32_71 = arith.constant 126 : i32
    %206 = tpu.dynamic_rotate %205 by %c126_i32_71 dim 1 : vector<16x128xf32>, i32 -> vector<16x128xf32>
    %c2_i32_72 = arith.constant 2 : i32
    %207 = tpu.dynamic_rotate %205 by %c2_i32_72 dim 1 : vector<16x128xf32>, i32 -> vector<16x128xf32>
    %c2_i32_73 = arith.constant 2 : i32
    %208 = vector.broadcast %c2_i32_73 : i32 to vector<1x128xi32>
    %209 = arith.andi %45, %208 : vector<1x128xi32>
    %c0_i32_74 = arith.constant 0 : i32
    %210 = vector.broadcast %c0_i32_74 : i32 to vector<1x128xi32>
    %211 = arith.cmpi eq, %209, %210 : vector<1x128xi32>
    %c16_i32_75 = arith.constant 16 : i32
    %212 = vector.broadcast %c16_i32_75 : i32 to vector<1x128xi32>
    %213 = arith.andi %45, %212 : vector<1x128xi32>
    %c0_i32_76 = arith.constant 0 : i32
    %214 = vector.broadcast %c0_i32_76 : i32 to vector<1x128xi32>
    %215 = arith.cmpi eq, %213, %214 : vector<1x128xi32>
    %216 = arith.xori %211, %215 : vector<1x128xi1>
    %cst_77 = arith.constant dense<true> : vector<1x128xi1>
    %217 = arith.xori %216, %cst_77 : vector<1x128xi1>
    %218 = vector.shape_cast %211 : vector<1x128xi1> to vector<1x128xi1>
    %219 = vector.broadcast %218 : vector<1x128xi1> to vector<16x128xi1>
    %220 = arith.select %219, %206, %207 : vector<16x128xi1>, vector<16x128xf32>
    %221 = arith.minimumf %205, %220 : vector<16x128xf32>
    %222 = arith.maximumf %205, %220 : vector<16x128xf32>
    %223 = vector.shape_cast %217 : vector<1x128xi1> to vector<1x128xi1>
    %224 = vector.broadcast %223 : vector<1x128xi1> to vector<16x128xi1>
    %225 = arith.select %224, %221, %222 : vector<16x128xi1>, vector<16x128xf32>
    %c127_i32_78 = arith.constant 127 : i32
    %226 = tpu.dynamic_rotate %225 by %c127_i32_78 dim 1 : vector<16x128xf32>, i32 -> vector<16x128xf32>
    %c1_i32_79 = arith.constant 1 : i32
    %227 = tpu.dynamic_rotate %225 by %c1_i32_79 dim 1 : vector<16x128xf32>, i32 -> vector<16x128xf32>
    %c1_i32_80 = arith.constant 1 : i32
    %228 = vector.broadcast %c1_i32_80 : i32 to vector<1x128xi32>
    %229 = arith.andi %45, %228 : vector<1x128xi32>
    %c0_i32_81 = arith.constant 0 : i32
    %230 = vector.broadcast %c0_i32_81 : i32 to vector<1x128xi32>
    %231 = arith.cmpi eq, %229, %230 : vector<1x128xi32>
    %c16_i32_82 = arith.constant 16 : i32
    %232 = vector.broadcast %c16_i32_82 : i32 to vector<1x128xi32>
    %233 = arith.andi %45, %232 : vector<1x128xi32>
    %c0_i32_83 = arith.constant 0 : i32
    %234 = vector.broadcast %c0_i32_83 : i32 to vector<1x128xi32>
    %235 = arith.cmpi eq, %233, %234 : vector<1x128xi32>
    %236 = arith.xori %231, %235 : vector<1x128xi1>
    %cst_84 = arith.constant dense<true> : vector<1x128xi1>
    %237 = arith.xori %236, %cst_84 : vector<1x128xi1>
    %238 = vector.shape_cast %231 : vector<1x128xi1> to vector<1x128xi1>
    %239 = vector.broadcast %238 : vector<1x128xi1> to vector<16x128xi1>
    %240 = arith.select %239, %226, %227 : vector<16x128xi1>, vector<16x128xf32>
    %241 = arith.minimumf %225, %240 : vector<16x128xf32>
    %242 = arith.maximumf %225, %240 : vector<16x128xf32>
    %243 = vector.shape_cast %237 : vector<1x128xi1> to vector<1x128xi1>
    %244 = vector.broadcast %243 : vector<1x128xi1> to vector<16x128xi1>
    %245 = arith.select %244, %241, %242 : vector<16x128xi1>, vector<16x128xf32>
    %c112_i32 = arith.constant 112 : i32
    %246 = tpu.dynamic_rotate %245 by %c112_i32 dim 1 : vector<16x128xf32>, i32 -> vector<16x128xf32>
    %c16_i32_85 = arith.constant 16 : i32
    %247 = tpu.dynamic_rotate %245 by %c16_i32_85 dim 1 : vector<16x128xf32>, i32 -> vector<16x128xf32>
    %c16_i32_86 = arith.constant 16 : i32
    %248 = vector.broadcast %c16_i32_86 : i32 to vector<1x128xi32>
    %249 = arith.andi %45, %248 : vector<1x128xi32>
    %c0_i32_87 = arith.constant 0 : i32
    %250 = vector.broadcast %c0_i32_87 : i32 to vector<1x128xi32>
    %251 = arith.cmpi eq, %249, %250 : vector<1x128xi32>
    %c32_i32_88 = arith.constant 32 : i32
    %252 = vector.broadcast %c32_i32_88 : i32 to vector<1x128xi32>
    %253 = arith.andi %45, %252 : vector<1x128xi32>
    %c0_i32_89 = arith.constant 0 : i32
    %254 = vector.broadcast %c0_i32_89 : i32 to vector<1x128xi32>
    %255 = arith.cmpi eq, %253, %254 : vector<1x128xi32>
    %256 = arith.xori %251, %255 : vector<1x128xi1>
    %cst_90 = arith.constant dense<true> : vector<1x128xi1>
    %257 = arith.xori %256, %cst_90 : vector<1x128xi1>
    %258 = vector.shape_cast %251 : vector<1x128xi1> to vector<1x128xi1>
    %259 = vector.broadcast %258 : vector<1x128xi1> to vector<16x128xi1>
    %260 = arith.select %259, %246, %247 : vector<16x128xi1>, vector<16x128xf32>
    %261 = arith.minimumf %245, %260 : vector<16x128xf32>
    %262 = arith.maximumf %245, %260 : vector<16x128xf32>
    %263 = vector.shape_cast %257 : vector<1x128xi1> to vector<1x128xi1>
    %264 = vector.broadcast %263 : vector<1x128xi1> to vector<16x128xi1>
    %265 = arith.select %264, %261, %262 : vector<16x128xi1>, vector<16x128xf32>
    %c120_i32_91 = arith.constant 120 : i32
    %266 = tpu.dynamic_rotate %265 by %c120_i32_91 dim 1 : vector<16x128xf32>, i32 -> vector<16x128xf32>
    %c8_i32_92 = arith.constant 8 : i32
    %267 = tpu.dynamic_rotate %265 by %c8_i32_92 dim 1 : vector<16x128xf32>, i32 -> vector<16x128xf32>
    %c8_i32_93 = arith.constant 8 : i32
    %268 = vector.broadcast %c8_i32_93 : i32 to vector<1x128xi32>
    %269 = arith.andi %45, %268 : vector<1x128xi32>
    %c0_i32_94 = arith.constant 0 : i32
    %270 = vector.broadcast %c0_i32_94 : i32 to vector<1x128xi32>
    %271 = arith.cmpi eq, %269, %270 : vector<1x128xi32>
    %c32_i32_95 = arith.constant 32 : i32
    %272 = vector.broadcast %c32_i32_95 : i32 to vector<1x128xi32>
    %273 = arith.andi %45, %272 : vector<1x128xi32>
    %c0_i32_96 = arith.constant 0 : i32
    %274 = vector.broadcast %c0_i32_96 : i32 to vector<1x128xi32>
    %275 = arith.cmpi eq, %273, %274 : vector<1x128xi32>
    %276 = arith.xori %271, %275 : vector<1x128xi1>
    %cst_97 = arith.constant dense<true> : vector<1x128xi1>
    %277 = arith.xori %276, %cst_97 : vector<1x128xi1>
    %278 = vector.shape_cast %271 : vector<1x128xi1> to vector<1x128xi1>
    %279 = vector.broadcast %278 : vector<1x128xi1> to vector<16x128xi1>
    %280 = arith.select %279, %266, %267 : vector<16x128xi1>, vector<16x128xf32>
    %281 = arith.minimumf %265, %280 : vector<16x128xf32>
    %282 = arith.maximumf %265, %280 : vector<16x128xf32>
    %283 = vector.shape_cast %277 : vector<1x128xi1> to vector<1x128xi1>
    %284 = vector.broadcast %283 : vector<1x128xi1> to vector<16x128xi1>
    %285 = arith.select %284, %281, %282 : vector<16x128xi1>, vector<16x128xf32>
    %c124_i32_98 = arith.constant 124 : i32
    %286 = tpu.dynamic_rotate %285 by %c124_i32_98 dim 1 : vector<16x128xf32>, i32 -> vector<16x128xf32>
    %c4_i32_99 = arith.constant 4 : i32
    %287 = tpu.dynamic_rotate %285 by %c4_i32_99 dim 1 : vector<16x128xf32>, i32 -> vector<16x128xf32>
    %c4_i32_100 = arith.constant 4 : i32
    %288 = vector.broadcast %c4_i32_100 : i32 to vector<1x128xi32>
    %289 = arith.andi %45, %288 : vector<1x128xi32>
    %c0_i32_101 = arith.constant 0 : i32
    %290 = vector.broadcast %c0_i32_101 : i32 to vector<1x128xi32>
    %291 = arith.cmpi eq, %289, %290 : vector<1x128xi32>
    %c32_i32_102 = arith.constant 32 : i32
    %292 = vector.broadcast %c32_i32_102 : i32 to vector<1x128xi32>
    %293 = arith.andi %45, %292 : vector<1x128xi32>
    %c0_i32_103 = arith.constant 0 : i32
    %294 = vector.broadcast %c0_i32_103 : i32 to vector<1x128xi32>
    %295 = arith.cmpi eq, %293, %294 : vector<1x128xi32>
    %296 = arith.xori %291, %295 : vector<1x128xi1>
    %cst_104 = arith.constant dense<true> : vector<1x128xi1>
    %297 = arith.xori %296, %cst_104 : vector<1x128xi1>
    %298 = vector.shape_cast %291 : vector<1x128xi1> to vector<1x128xi1>
    %299 = vector.broadcast %298 : vector<1x128xi1> to vector<16x128xi1>
    %300 = arith.select %299, %286, %287 : vector<16x128xi1>, vector<16x128xf32>
    %301 = arith.minimumf %285, %300 : vector<16x128xf32>
    %302 = arith.maximumf %285, %300 : vector<16x128xf32>
    %303 = vector.shape_cast %297 : vector<1x128xi1> to vector<1x128xi1>
    %304 = vector.broadcast %303 : vector<1x128xi1> to vector<16x128xi1>
    %305 = arith.select %304, %301, %302 : vector<16x128xi1>, vector<16x128xf32>
    %c126_i32_105 = arith.constant 126 : i32
    %306 = tpu.dynamic_rotate %305 by %c126_i32_105 dim 1 : vector<16x128xf32>, i32 -> vector<16x128xf32>
    %c2_i32_106 = arith.constant 2 : i32
    %307 = tpu.dynamic_rotate %305 by %c2_i32_106 dim 1 : vector<16x128xf32>, i32 -> vector<16x128xf32>
    %c2_i32_107 = arith.constant 2 : i32
    %308 = vector.broadcast %c2_i32_107 : i32 to vector<1x128xi32>
    %309 = arith.andi %45, %308 : vector<1x128xi32>
    %c0_i32_108 = arith.constant 0 : i32
    %310 = vector.broadcast %c0_i32_108 : i32 to vector<1x128xi32>
    %311 = arith.cmpi eq, %309, %310 : vector<1x128xi32>
    %c32_i32_109 = arith.constant 32 : i32
    %312 = vector.broadcast %c32_i32_109 : i32 to vector<1x128xi32>
    %313 = arith.andi %45, %312 : vector<1x128xi32>
    %c0_i32_110 = arith.constant 0 : i32
    %314 = vector.broadcast %c0_i32_110 : i32 to vector<1x128xi32>
    %315 = arith.cmpi eq, %313, %314 : vector<1x128xi32>
    %316 = arith.xori %311, %315 : vector<1x128xi1>
    %cst_111 = arith.constant dense<true> : vector<1x128xi1>
    %317 = arith.xori %316, %cst_111 : vector<1x128xi1>
    %318 = vector.shape_cast %311 : vector<1x128xi1> to vector<1x128xi1>
    %319 = vector.broadcast %318 : vector<1x128xi1> to vector<16x128xi1>
    %320 = arith.select %319, %306, %307 : vector<16x128xi1>, vector<16x128xf32>
    %321 = arith.minimumf %305, %320 : vector<16x128xf32>
    %322 = arith.maximumf %305, %320 : vector<16x128xf32>
    %323 = vector.shape_cast %317 : vector<1x128xi1> to vector<1x128xi1>
    %324 = vector.broadcast %323 : vector<1x128xi1> to vector<16x128xi1>
    %325 = arith.select %324, %321, %322 : vector<16x128xi1>, vector<16x128xf32>
    %c127_i32_112 = arith.constant 127 : i32
    %326 = tpu.dynamic_rotate %325 by %c127_i32_112 dim 1 : vector<16x128xf32>, i32 -> vector<16x128xf32>
    %c1_i32_113 = arith.constant 1 : i32
    %327 = tpu.dynamic_rotate %325 by %c1_i32_113 dim 1 : vector<16x128xf32>, i32 -> vector<16x128xf32>
    %c1_i32_114 = arith.constant 1 : i32
    %328 = vector.broadcast %c1_i32_114 : i32 to vector<1x128xi32>
    %329 = arith.andi %45, %328 : vector<1x128xi32>
    %c0_i32_115 = arith.constant 0 : i32
    %330 = vector.broadcast %c0_i32_115 : i32 to vector<1x128xi32>
    %331 = arith.cmpi eq, %329, %330 : vector<1x128xi32>
    %c32_i32_116 = arith.constant 32 : i32
    %332 = vector.broadcast %c32_i32_116 : i32 to vector<1x128xi32>
    %333 = arith.andi %45, %332 : vector<1x128xi32>
    %c0_i32_117 = arith.constant 0 : i32
    %334 = vector.broadcast %c0_i32_117 : i32 to vector<1x128xi32>
    %335 = arith.cmpi eq, %333, %334 : vector<1x128xi32>
    %336 = arith.xori %331, %335 : vector<1x128xi1>
    %cst_118 = arith.constant dense<true> : vector<1x128xi1>
    %337 = arith.xori %336, %cst_118 : vector<1x128xi1>
    %338 = vector.shape_cast %331 : vector<1x128xi1> to vector<1x128xi1>
    %339 = vector.broadcast %338 : vector<1x128xi1> to vector<16x128xi1>
    %340 = arith.select %339, %326, %327 : vector<16x128xi1>, vector<16x128xf32>
    %341 = arith.minimumf %325, %340 : vector<16x128xf32>
    %342 = arith.maximumf %325, %340 : vector<16x128xf32>
    %343 = vector.shape_cast %337 : vector<1x128xi1> to vector<1x128xi1>
    %344 = vector.broadcast %343 : vector<1x128xi1> to vector<16x128xi1>
    %345 = arith.select %344, %341, %342 : vector<16x128xi1>, vector<16x128xf32>
    %cst_119 = arith.constant 0.000000e+00 : f32
    %346 = vector.shape_cast %40 : vector<1x128xi1> to vector<1x128xi1>
    %347 = vector.broadcast %346 : vector<1x128xi1> to vector<16x128xi1>
    %348 = vector.broadcast %cst_119 : f32 to vector<16x128xf32>
    %349 = arith.select %347, %345, %348 : vector<16x128xi1>, vector<16x128xf32>
    %cst_120 = arith.constant dense<0xFF800000> : vector<16xf32>
    %350 = vector.multi_reduction <maximumf>, %37, %cst_120 [1] : vector<16x128xf32> to vector<16xf32>
    %351 = vector.shape_cast %350 : vector<16xf32> to vector<16x1xf32>
    %352 = tpu.iota {dimensions = array<i32: 0>} : vector<16x16xi32>
    %353 = tpu.iota {dimensions = array<i32: 1>} : vector<16x16xi32>
    %354 = arith.cmpi eq, %352, %353 : vector<16x16xi32>
    %cst_121 = arith.constant -3.000000e+38 : f32
    %355 = vector.shape_cast %351 : vector<16x1xf32> to vector<16x1xf32>
    %356 = vector.broadcast %355 : vector<16x1xf32> to vector<16x16xf32>
    %357 = vector.broadcast %cst_121 : f32 to vector<16x16xf32>
    %358 = arith.select %354, %356, %357 : vector<16x16xi1>, vector<16x16xf32>
    %cst_122 = arith.constant dense<0xFF800000> : vector<16xf32>
    %359 = vector.multi_reduction <maximumf>, %358, %cst_122 [0] : vector<16x16xf32> to vector<16xf32>
    %360 = vector.shape_cast %359 : vector<16xf32> to vector<1x16xf32>
    %361 = vector.broadcast %351 : vector<16x1xf32> to vector<16x16xf32>
    %362 = vector.broadcast %360 : vector<1x16xf32> to vector<16x16xf32>
    %363 = arith.cmpf ogt, %361, %362 : vector<16x16xf32>
    %364 = vector.broadcast %351 : vector<16x1xf32> to vector<16x16xf32>
    %365 = vector.broadcast %360 : vector<1x16xf32> to vector<16x16xf32>
    %366 = arith.cmpf oeq, %364, %365 : vector<16x16xf32>
    %367 = arith.cmpi slt, %352, %353 : vector<16x16xi32>
    %368 = arith.andi %366, %367 : vector<16x16xi1>
    %369 = arith.ori %363, %368 : vector<16x16xi1>
    %370 = arith.extui %369 : vector<16x16xi1> to vector<16x16xi32>
    %371 = arith.sitofp %370 : vector<16x16xi32> to vector<16x16xf32>
    %cst_123 = arith.constant dense<0.000000e+00> : vector<16xf32>
    %372 = vector.multi_reduction <add>, %371, %cst_123 [0] : vector<16x16xf32> to vector<16xf32>
    %373 = vector.shape_cast %372 : vector<16xf32> to vector<1x16xf32>
    %374 = tpu.iota {dimensions = array<i32: 0>} : vector<10x16xi32>
    %375 = arith.sitofp %374 : vector<10x16xi32> to vector<10x16xf32>
    %376 = vector.broadcast %373 : vector<1x16xf32> to vector<10x16xf32>
    %377 = arith.subf %376, %375 : vector<10x16xf32>
    %378 = math.absf %377 : vector<10x16xf32>
    %cst_124 = arith.constant 5.000000e-01 : f32
    %379 = vector.broadcast %cst_124 : f32 to vector<10x16xf32>
    %380 = arith.cmpf olt, %378, %379 : vector<10x16xf32>
    %381 = arith.extui %380 : vector<10x16xi1> to vector<10x16xi32>
    %382 = arith.sitofp %381 : vector<10x16xi32> to vector<10x16xf32>
    %cst_125 = arith.constant dense<0.000000e+00> : vector<10x128xf32>
    %383 = tpu.matmul %382, %349, %cst_125 {dimension_numbers = #tpu.dot_dimension_numbers<[1], [0], [0], [1], [0, 0, 1, 1], [], []>} : vector<10x16xf32>, vector<16x128xf32>, vector<10x128xf32> -> vector<10x128xf32>
    %c0_126 = arith.constant 0 : index
    %c0_127 = arith.constant 0 : index
    %384 = vector.load %arg8[%c0_126, %c0_127] : memref<1x128xf32, #tpu.memory_space<vmem>>, vector<1x128xf32>
    %385 = vector.extract_strided_slice %383 {offsets = [0, 0], sizes = [1, 128], strides = [1, 1]} : vector<10x128xf32> to vector<1x128xf32>
    %c0_128 = arith.constant 0 : index
    %c0_129 = arith.constant 0 : index
    %c0_130 = arith.constant 0 : index
    %386 = vector.load %arg7[%c0_128, %c0_129, %c0_130] : memref<10x128x128xf32, #tpu.memory_space<vmem>>, vector<1x128x128xf32>
    %387 = vector.shape_cast %386 : vector<1x128x128xf32> to vector<128x128xf32>
    %cst_131 = arith.constant dense<0.000000e+00> : vector<1x128xf32>
    %388 = tpu.matmul %385, %387, %cst_131 {dimension_numbers = #tpu.dot_dimension_numbers<[1], [0], [0], [1], [0, 0, 1, 1], [], []>} : vector<1x128xf32>, vector<128x128xf32>, vector<1x128xf32> -> vector<1x128xf32>
    %389 = arith.addf %384, %388 : vector<1x128xf32>
    %390 = vector.extract_strided_slice %383 {offsets = [1, 0], sizes = [1, 128], strides = [1, 1]} : vector<10x128xf32> to vector<1x128xf32>
    %c1 = arith.constant 1 : index
    %c0_132 = arith.constant 0 : index
    %c0_133 = arith.constant 0 : index
    %391 = vector.load %arg7[%c1, %c0_132, %c0_133] : memref<10x128x128xf32, #tpu.memory_space<vmem>>, vector<1x128x128xf32>
    %392 = vector.shape_cast %391 : vector<1x128x128xf32> to vector<128x128xf32>
    %cst_134 = arith.constant dense<0.000000e+00> : vector<1x128xf32>
    %393 = tpu.matmul %390, %392, %cst_134 {dimension_numbers = #tpu.dot_dimension_numbers<[1], [0], [0], [1], [0, 0, 1, 1], [], []>} : vector<1x128xf32>, vector<128x128xf32>, vector<1x128xf32> -> vector<1x128xf32>
    %394 = arith.addf %389, %393 : vector<1x128xf32>
    %395 = vector.extract_strided_slice %383 {offsets = [2, 0], sizes = [1, 128], strides = [1, 1]} : vector<10x128xf32> to vector<1x128xf32>
    %c2 = arith.constant 2 : index
    %c0_135 = arith.constant 0 : index
    %c0_136 = arith.constant 0 : index
    %396 = vector.load %arg7[%c2, %c0_135, %c0_136] : memref<10x128x128xf32, #tpu.memory_space<vmem>>, vector<1x128x128xf32>
    %397 = vector.shape_cast %396 : vector<1x128x128xf32> to vector<128x128xf32>
    %cst_137 = arith.constant dense<0.000000e+00> : vector<1x128xf32>
    %398 = tpu.matmul %395, %397, %cst_137 {dimension_numbers = #tpu.dot_dimension_numbers<[1], [0], [0], [1], [0, 0, 1, 1], [], []>} : vector<1x128xf32>, vector<128x128xf32>, vector<1x128xf32> -> vector<1x128xf32>
    %399 = arith.addf %394, %398 : vector<1x128xf32>
    %400 = vector.extract_strided_slice %383 {offsets = [3, 0], sizes = [1, 128], strides = [1, 1]} : vector<10x128xf32> to vector<1x128xf32>
    %c3 = arith.constant 3 : index
    %c0_138 = arith.constant 0 : index
    %c0_139 = arith.constant 0 : index
    %401 = vector.load %arg7[%c3, %c0_138, %c0_139] : memref<10x128x128xf32, #tpu.memory_space<vmem>>, vector<1x128x128xf32>
    %402 = vector.shape_cast %401 : vector<1x128x128xf32> to vector<128x128xf32>
    %cst_140 = arith.constant dense<0.000000e+00> : vector<1x128xf32>
    %403 = tpu.matmul %400, %402, %cst_140 {dimension_numbers = #tpu.dot_dimension_numbers<[1], [0], [0], [1], [0, 0, 1, 1], [], []>} : vector<1x128xf32>, vector<128x128xf32>, vector<1x128xf32> -> vector<1x128xf32>
    %404 = arith.addf %399, %403 : vector<1x128xf32>
    %405 = vector.extract_strided_slice %383 {offsets = [4, 0], sizes = [1, 128], strides = [1, 1]} : vector<10x128xf32> to vector<1x128xf32>
    %c4 = arith.constant 4 : index
    %c0_141 = arith.constant 0 : index
    %c0_142 = arith.constant 0 : index
    %406 = vector.load %arg7[%c4, %c0_141, %c0_142] : memref<10x128x128xf32, #tpu.memory_space<vmem>>, vector<1x128x128xf32>
    %407 = vector.shape_cast %406 : vector<1x128x128xf32> to vector<128x128xf32>
    %cst_143 = arith.constant dense<0.000000e+00> : vector<1x128xf32>
    %408 = tpu.matmul %405, %407, %cst_143 {dimension_numbers = #tpu.dot_dimension_numbers<[1], [0], [0], [1], [0, 0, 1, 1], [], []>} : vector<1x128xf32>, vector<128x128xf32>, vector<1x128xf32> -> vector<1x128xf32>
    %409 = arith.addf %404, %408 : vector<1x128xf32>
    %410 = vector.extract_strided_slice %383 {offsets = [5, 0], sizes = [1, 128], strides = [1, 1]} : vector<10x128xf32> to vector<1x128xf32>
    %c5 = arith.constant 5 : index
    %c0_144 = arith.constant 0 : index
    %c0_145 = arith.constant 0 : index
    %411 = vector.load %arg7[%c5, %c0_144, %c0_145] : memref<10x128x128xf32, #tpu.memory_space<vmem>>, vector<1x128x128xf32>
    %412 = vector.shape_cast %411 : vector<1x128x128xf32> to vector<128x128xf32>
    %cst_146 = arith.constant dense<0.000000e+00> : vector<1x128xf32>
    %413 = tpu.matmul %410, %412, %cst_146 {dimension_numbers = #tpu.dot_dimension_numbers<[1], [0], [0], [1], [0, 0, 1, 1], [], []>} : vector<1x128xf32>, vector<128x128xf32>, vector<1x128xf32> -> vector<1x128xf32>
    %414 = arith.addf %409, %413 : vector<1x128xf32>
    %415 = vector.extract_strided_slice %383 {offsets = [6, 0], sizes = [1, 128], strides = [1, 1]} : vector<10x128xf32> to vector<1x128xf32>
    %c6 = arith.constant 6 : index
    %c0_147 = arith.constant 0 : index
    %c0_148 = arith.constant 0 : index
    %416 = vector.load %arg7[%c6, %c0_147, %c0_148] : memref<10x128x128xf32, #tpu.memory_space<vmem>>, vector<1x128x128xf32>
    %417 = vector.shape_cast %416 : vector<1x128x128xf32> to vector<128x128xf32>
    %cst_149 = arith.constant dense<0.000000e+00> : vector<1x128xf32>
    %418 = tpu.matmul %415, %417, %cst_149 {dimension_numbers = #tpu.dot_dimension_numbers<[1], [0], [0], [1], [0, 0, 1, 1], [], []>} : vector<1x128xf32>, vector<128x128xf32>, vector<1x128xf32> -> vector<1x128xf32>
    %419 = arith.addf %414, %418 : vector<1x128xf32>
    %420 = vector.extract_strided_slice %383 {offsets = [7, 0], sizes = [1, 128], strides = [1, 1]} : vector<10x128xf32> to vector<1x128xf32>
    %c7 = arith.constant 7 : index
    %c0_150 = arith.constant 0 : index
    %c0_151 = arith.constant 0 : index
    %421 = vector.load %arg7[%c7, %c0_150, %c0_151] : memref<10x128x128xf32, #tpu.memory_space<vmem>>, vector<1x128x128xf32>
    %422 = vector.shape_cast %421 : vector<1x128x128xf32> to vector<128x128xf32>
    %cst_152 = arith.constant dense<0.000000e+00> : vector<1x128xf32>
    %423 = tpu.matmul %420, %422, %cst_152 {dimension_numbers = #tpu.dot_dimension_numbers<[1], [0], [0], [1], [0, 0, 1, 1], [], []>} : vector<1x128xf32>, vector<128x128xf32>, vector<1x128xf32> -> vector<1x128xf32>
    %424 = arith.addf %419, %423 : vector<1x128xf32>
    %425 = vector.extract_strided_slice %383 {offsets = [8, 0], sizes = [1, 128], strides = [1, 1]} : vector<10x128xf32> to vector<1x128xf32>
    %c8 = arith.constant 8 : index
    %c0_153 = arith.constant 0 : index
    %c0_154 = arith.constant 0 : index
    %426 = vector.load %arg7[%c8, %c0_153, %c0_154] : memref<10x128x128xf32, #tpu.memory_space<vmem>>, vector<1x128x128xf32>
    %427 = vector.shape_cast %426 : vector<1x128x128xf32> to vector<128x128xf32>
    %cst_155 = arith.constant dense<0.000000e+00> : vector<1x128xf32>
    %428 = tpu.matmul %425, %427, %cst_155 {dimension_numbers = #tpu.dot_dimension_numbers<[1], [0], [0], [1], [0, 0, 1, 1], [], []>} : vector<1x128xf32>, vector<128x128xf32>, vector<1x128xf32> -> vector<1x128xf32>
    %429 = arith.addf %424, %428 : vector<1x128xf32>
    %430 = vector.extract_strided_slice %383 {offsets = [9, 0], sizes = [1, 128], strides = [1, 1]} : vector<10x128xf32> to vector<1x128xf32>
    %c9 = arith.constant 9 : index
    %c0_156 = arith.constant 0 : index
    %c0_157 = arith.constant 0 : index
    %431 = vector.load %arg7[%c9, %c0_156, %c0_157] : memref<10x128x128xf32, #tpu.memory_space<vmem>>, vector<1x128x128xf32>
    %432 = vector.shape_cast %431 : vector<1x128x128xf32> to vector<128x128xf32>
    %cst_158 = arith.constant dense<0.000000e+00> : vector<1x128xf32>
    %433 = tpu.matmul %430, %432, %cst_158 {dimension_numbers = #tpu.dot_dimension_numbers<[1], [0], [0], [1], [0, 0, 1, 1], [], []>} : vector<1x128xf32>, vector<128x128xf32>, vector<1x128xf32> -> vector<1x128xf32>
    %434 = arith.addf %429, %433 : vector<1x128xf32>
    %c0_159 = arith.constant 0 : index
    %c0_160 = arith.constant 0 : index
    %c0_161 = arith.constant 0 : index
    %435 = vector.load %arg9[%c0_159, %c0_160, %c0_161] : memref<1x1x128xf32, #tpu.memory_space<vmem>>, vector<1x1x128xf32>
    %436 = vector.shape_cast %435 : vector<1x1x128xf32> to vector<1x128xf32>
    %437 = vector.shape_cast %434 : vector<1x128xf32> to vector<1x1x128xf32>
    tpu.vector_store %arg9[%c0_159, %c0_160, %c0_161], %437 {strides = array<i32>} : memref<1x1x128xf32, #tpu.memory_space<vmem>>, vector<1x1x128xf32>,
    return
  }
  func.func @transform_0(%arg0: i32) -> (i32, i32, i32) {
    %c0_i32 = arith.constant 0 : i32
    %c0_i32_0 = arith.constant 0 : i32
    %c0_i32_1 = arith.constant 0 : i32
    return %arg0, %c0_i32, %c0_i32_0 : i32, i32, i32
  }
  func.func @transform_1(%arg0: i32) -> (i32, i32, i32) {
    %c0_i32 = arith.constant 0 : i32
    %c0_i32_0 = arith.constant 0 : i32
    %c0_i32_1 = arith.constant 0 : i32
    return %arg0, %c0_i32, %c0_i32_0 : i32, i32, i32
  }
  func.func @transform_2(%arg0: i32) -> (i32, i32) {
    %c0_i32 = arith.constant 0 : i32
    %c0_i32_0 = arith.constant 0 : i32
    %c0_i32_1 = arith.constant 0 : i32
    return %c0_i32, %c0_i32_0 : i32, i32
  }
  func.func @transform_3(%arg0: i32) -> (i32, i32) {
    %c0_i32 = arith.constant 0 : i32
    %c0_i32_0 = arith.constant 0 : i32
    %c0_i32_1 = arith.constant 0 : i32
    return %c0_i32, %c0_i32_0 : i32, i32
  }
  func.func @transform_4(%arg0: i32) -> (i32, i32) {
    %c0_i32 = arith.constant 0 : i32
    %c0_i32_0 = arith.constant 0 : i32
    %c0_i32_1 = arith.constant 0 : i32
    return %c0_i32, %c0_i32_0 : i32, i32
  }
  func.func @transform_5(%arg0: i32) -> (i32, i32) {
    %c0_i32 = arith.constant 0 : i32
    %c0_i32_0 = arith.constant 0 : i32
    %c0_i32_1 = arith.constant 0 : i32
    return %c0_i32, %c0_i32_0 : i32, i32
  }
  func.func @transform_6(%arg0: i32) -> (i32, i32, i32) {
    %c0_i32 = arith.constant 0 : i32
    %c0_i32_0 = arith.constant 0 : i32
    %c0_i32_1 = arith.constant 0 : i32
    %c0_i32_2 = arith.constant 0 : i32
    return %c0_i32, %c0_i32_0, %c0_i32_1 : i32, i32, i32
  }
  func.func @transform_7(%arg0: i32) -> (i32, i32) {
    %c0_i32 = arith.constant 0 : i32
    %c0_i32_0 = arith.constant 0 : i32
    %c0_i32_1 = arith.constant 0 : i32
    return %c0_i32, %c0_i32_0 : i32, i32
  }
  func.func @transform_8(%arg0: i32) -> (i32, i32, i32) {
    %c0_i32 = arith.constant 0 : i32
    %c0_i32_0 = arith.constant 0 : i32
    %c0_i32_1 = arith.constant 0 : i32
    return %arg0, %c0_i32, %c0_i32_0 : i32, i32, i32
  }
}

</mosaic_0001>

<bundles_post_ra>
// kernel: mesh_network_srpr_forward.1
= control target key start
LH: loop header
LB: loop body
LE: loop exit
PB: predicated region body
PF: predicated region fallthrough
CT: control target
= control target key end

     0   :  { %13 = vsyncpa [#allocation3], 0  ;;  %s3106_s0 = inlined_call_operand.vmem [shape: f32[1,16,16], index: 0, kind: input, shape index: {}]   ;;  %s3107_s1 = inlined_call_operand.vmem [shape: f32[1,16,32], index: 1, kind: input, shape index: {}]   ;;  %s3108_s2 = inlined_call_operand.vmem [shape: f32[32,32], index: 2, kind: input, shape index: {}]   ;;  %s3109_s3 = inlined_call_operand.vmem [shape: f32[1,32], index: 3, kind: input, shape index: {}]   ;;  %s3110_s4 = inlined_call_operand.hbm [shape: f32[32,128], index: 4, kind: input, shape index: {}]   ;;  %s3111_s5 = inlined_call_operand.vmem [shape: f32[1,128], index: 5, kind: input, shape index: {}]   ;;  %s3112_s6 = inlined_call_operand.hbm [shape: f32[10,128,128], index: 6, kind: input, shape index: {}]   ;;  %s3113_s7 = inlined_call_operand.vmem [shape: f32[1,128], index: 7, kind: input, shape index: {}]   ;;  %s3114_s8 = inlined_call_operand.hbm [shape: f32[1,1,128], index: 8, kind: output, shape index: {}]  }
   0x1   :  { %14 = vsyncpa [#allocation6], 0 }
   0x2   :  { %15 = vsyncpa [#allocation4], 0  ;;  %s2510_s27 = smov [#allocation2]  }
   0x3   :  { %s29_s28 = sshll.u32 %s2510_s27, 4  ;;  %s30_s28 = int_to_ptr.vmem [resolvable:$true] %s29_s28 }
   0x4   :  { %s2452_s29 = scalar_lea.vmem %s30_s28, 512  ;;  %p2457_p1 = scmp.lt.s32.totalorder %s30_s28, %s30_s28 }
   0x5   :  { %p2453_p0 = scmp.ne.s32.totalorder %s30_s28, %s2452_s29  ;;  %p2458_p2 = scmp.lt.s32.totalorder %s2452_s29, %s2452_s29 }
   0x7   :  { %p2459_p3 = por %p2458_p2, %p2457_p1 }
   0x9   :  { %p2460_p4 = pnand %p2459_p3, %p2453_p0 }
   0xb   :  { %2463 = shalt.err (!%p2460_p4)
}
   0xc   :  { %s2511_s30 = smov 128   ;;  %s2512_s9 = smov 8  }
   0xd   :  { %35 = dma.hbm_to_vmem [thread:$0]  %s3110_s4, 512, %s30_s28, [#allocation3], %s2511_s30, %s2511_s30, %s2512_s9  }
   0xe   :  { %s2513_s12 = smov [#allocation5]  }
   0xf   :  { %s43_s13 = sshll.u32 %s2513_s12, 4  ;;  %s44_s13 = int_to_ptr.vmem [resolvable:$true] %s43_s13 }
  0x10   :  { %s2472_s14 = scalar_lea.vmem %s44_s13, 20480  ;;  %p2477_p6 = scmp.lt.s32.totalorder %s44_s13, %s44_s13 }
  0x11   :  { %p2473_p5 = scmp.ne.s32.totalorder %s44_s13, %s2472_s14  ;;  %p2478_p7 = scmp.lt.s32.totalorder %s2472_s14, %s2472_s14 }
  0x13   :  { %p2479_p8 = por %p2478_p7, %p2477_p6 }
  0x15   :  { %p2480_p9 = pnand %p2479_p8, %p2473_p5 }
  0x17   :  { %2483 = shalt.err (!%p2480_p9)
}
  0x18   :  { %49 = dma.hbm_to_vmem [thread:$0]  %s3112_s6, 20480, %s44_s13, [#allocation6], %s2511_s30, %s2511_s30, %s2512_s9  }
  0x19   :  { %2504 = dma.done.wait [#allocation3], 512  }
  0x1a   :  { %2505 = vsyncadd [#allocation3], 4294966784 }
  0x1b   :  { %2506 = dma.done.wait [#allocation6], 20480  }
  0x1c   :  { %2507 = vsyncadd [#allocation6], 4294946816  ;;  %vm93_vm0 = vcmask 261120   ;;  %v92_v0 = vld [vmem:[%s3108_s2 + $0x18] sm:$0xff]  ;;  %v91_v1 = vld [vmem:[%s3108_s2 + $0x10] sm:$0xff]  ;;  %vm60_vm1 = vcmask 130048   ;;  %v434_v44 = vlaneseq }
  0x1d   :  { %2028 = vmatprep.subr.mxu0 %v92_v0  ;;  %v87_v2 = vld [vmem:[%s3107_s1] sm:$0xff]  ;;  %v90_v3 = vld [vmem:[%s3108_s2 + $0x8] sm:$0xff]  ;;  %v268_v31 = vld [vmem:[#allocation2 + $0x18] sm:$0xff]  ;;  %s2515_s10 = smov 1   ;;  %vm2516_vm9 = vmmov 1   ;;  %s2517_s11 = smov 126  }
  0x1e   :  { %2029 = vmatpush3.msra.mxu0 %v92_v0  ;;  %2036 = vmatprep.mubr.msk.f32.mxu0 %vm93_vm0, %v87_v2  ;;  %v58_v4 = vld [vmem:[%s3106_s0] sm:$0xff]  ;;  %v59_v5 = vld [vmem:[%s3106_s0 + $0x8] sm:$0xff]  ;;  %v267_v32 = vld [vmem:[#allocation2 + $0x10] sm:$0xff]  ;;  %v2621_v46 = vand.u32 127, %v434_v44  ;;  %s2518_s12 = smov 2   ;;  %s2519_s13 = smov 4  }
  0x1f   :  { %2030 = vmatprep.subr.mxu0 %v91_v1  ;;  %v61_v6 = vsel %vm60_vm1, %v58_v4, 0.0  ;;  %v64_v7 = vsel %vm60_vm1, %v59_v5, 0.0  ;;  %v89_v8 = vld [vmem:[%s3108_s2] sm:$0xff]  ;;  %v88_v10 = vld [vmem:[%s3107_s1 + $0x8] sm:$0xff]  ;;  %s2520_s14 = smov 124   ;;  %s2521_s15 = smov 120  }
  0x20   :  { %2031 = vmatpush3.msra.mxu0 %v91_v1  ;;  %62 = vadd.xlane.f32.xlu0 %v61_v6  ;;  %v67_v9 = vadd.f32 %v64_v7, %v61_v6  ;;  %v266_v33 = vld [vmem:[#allocation2 + $0x8] sm:$0xff]  ;;  %v265_v34 = vld [vmem:[#allocation2] sm:$0xff]  ;;  %vm436_vm5 = vcmp.lt.s32.totalorder %v2621_v46, 32  ;;  %v449_v55 = vand.u32 1, %v2621_v46  ;;  %v451_v56 = vand.u32 2, %v2621_v46  ;;  %s2522_s16 = smov 16  }
  0x21   :  { %2032 = vmatprep.subr.mxu0 %v90_v3  ;;  %v1818_v35 = vld [vmem:[%s3109_s3] ss:$0 sm:$0xff]  ;;  %s2523_s4 = smov 112   ;;  %v913_v58 = vld [vmem:[#allocation5 + $0x58] sm:$0xff]  ;;  %v1004_v57 = vld [vmem:[#allocation5 + $0xf0] sm:$0xff] }
  0x22   :  { %2033 = vmatpush3.msra.mxu0 %v90_v3  ;;  %v68_v11 = vrot.slane %v67_v9, 4  ;;  %v1823_v45 = vld [vmem:[%s3111_s5] ss:$0 sm:$0xff]  ;;  %s2514_s5 = smov 127   ;;  %vm2644_vm6 = vcmp.eq.s32.totalorder %v449_v55, 0  ;;  %vm2648_vm7 = vcmp.eq.s32.totalorder %v451_v56, 0 }
  0x23   :  { %2034 = vmatprep.subr.mxu0 %v89_v8  ;;  %vm453_vm8 = vmxor %vm2644_vm6, %vm2648_vm7 }
  0x24   :  { %2035 = vmatpush3.msra.mxu0 %v89_v8  ;;  %65 = vadd.xlane.f32.xlu0 %v64_v7  ;;  %v69_v12 = vadd.f32 %v68_v11, %v67_v9  ;;  %vm454_vm10 = vmxor %vm453_vm8, %vm2516_vm9  ;;  %v475_v7 = vand.u32 4, %v2621_v46 }
  0x25   :  { %2037 = vmatmul.mubr.msk.f32.vlgmr.msra.gmra.mxu0 %vm93_vm0, %v88_v10 }
  0x26   :  { %v70_v13 = vrot.slane %v69_v12, 2  ;;  %vm2666_vm11 = vcmp.eq.s32.totalorder %v475_v7, 0 }
  0x27   :  { %vm477_vm12 = vmxor %vm2648_vm7, %vm2666_vm11 }
  0x28   :  { %v71_v14 = vadd.f32 %v70_v13, %v69_v12  ;;  %vm478_vm13 = vmxor %vm477_vm12, %vm2516_vm9 }
  0x29   :  { %vm499_vm14 = vmxor %vm2644_vm6, %vm2666_vm11 }
  0x2a   :  { %v72_v15 = vrot.slane %v71_v14, 1  ;;  %vm500_vm15 = vmxor %vm499_vm14, %vm2516_vm9 }
  0x2c   :  { %v73_v16 = vadd.f32 %v72_v15, %v71_v14 }
  0x2e   :  { %2438 = vrsqrt.f32 %v73_v16  ;;  %vm80_vm3 = vcmp.gt.f32.partialorder %v73_v16, 0.0 }
  0x3b   :  { %v2439_v18 = vpop.eup %2438 }
  0x3c   :  { %v82_v21 = vsel %vm80_vm3, %v2439_v18, 0.0 }
  0xa9   :  { %v63_v17 = vpop.xlane.xlu0 %62 }
  0xaa   :  { %2440 = vrsqrt.f32 %v63_v17  ;;  %vm74_vm2 = vcmp.gt.f32.partialorder %v63_v17, 0.0 }
  0xad   :  { %v66_v24 = vpop.xlane.xlu0 %65 }
  0xae   :  { %2442 = vrsqrt.f32 %v66_v24  ;;  %vm75_vm4 = vcmp.gt.f32.partialorder %v66_v24, 0.0 }
  0xb7   :  { %v2441_v19 = vpop.eup %2440 }
  0xb8   :  { %v78_v20 = vsel %vm74_vm2, %v2441_v19, 0.0 }
  0xb9   :  { %v83_v22 = vmul.f32 %v78_v20, %v58_v4 }
  0xbb   :  { %v85_v23 = vmul.f32 %v83_v22, %v82_v21  ;;  %v2443_v25 = vpop.eup %2442 }
  0xbc   :  { %v79_v26 = vsel %vm75_vm4, %v2443_v25, 0.0 }
  0xbd   :  { %2043 = vmatprep.mubr.msk.f32.mxu1 %vm60_vm1, %v85_v23  ;;  %2061 = vmatprep.mubr.msk.f32.mxu0 %vm60_vm1, %v85_v23  ;;  %v84_v27 = vmul.f32 %v79_v26, %v59_v5 }
  0xbf   :  { %v86_v30 = vmul.f32 %v84_v27, %v82_v21 }
  0xe5   :  { %v2038_v28 = vpop.f32.mrf.mxu0 }
  0xe6   :  { %2039 = vmatprep.subr.mxu1 %v2038_v28 }
  0xe7   :  { %v166_v29 = vpop.f32.mrf.mxu0  ;;  %2040 = vmatpush3.msra.mxu1 %v2038_v28 }
  0xe8   :  { %2041 = vmatprep.subr.mxu1 %v166_v29 }
  0xe9   :  { %2042 = vmatpush3.msra.mxu1 %v166_v29 }
  0xea   :  { %2044 = vmatmul.mubr.msk.f32.vlgmr.msra.gmra.mxu1 %vm60_vm1, %v86_v30  ;;  %2046 = vmatprep.subr.mxu1 %v268_v31 }
  0xeb   :  { %2047 = vmatpush3.msra.mxu1 %v268_v31 }
  0xec   :  { %2048 = vmatprep.subr.mxu1 %v267_v32 }
  0xed   :  { %2049 = vmatpush3.msra.mxu1 %v267_v32 }
  0xee   :  { %2050 = vmatprep.subr.mxu1 %v266_v33 }
  0xef   :  { %2051 = vmatpush3.msra.mxu1 %v266_v33  ;;  %v519_v33 = vand.u32 8, %v2621_v46 }
  0xf0   :  { %2052 = vmatprep.subr.mxu1 %v265_v34 }
  0xf1   :  { %2053 = vmatpush3.msra.mxu1 %v265_v34 }
 0x1aa   :  { %v2045_v36 = vpop.f32.mrf.mxu1 }
 0x1ab   :  { %v260_v37 = vadd.f32 %v2045_v36, %v1818_v35 }
 0x1ac   :  { %v254_v38 = vpop.f32.mrf.mxu1 }
 0x1ad   :  { %v255_v39 = vadd.f32 %v1818_v35, %v254_v38  ;;  %v264_v41 = vmax.f32 %v260_v37, 0.0 }
 0x1af   :  { %v263_v40 = vmax.f32 %v255_v39, 0.0 }
 0x1b1   :  { %2054 = vmatprep.mubr.msk.f32.mxu1 %vm93_vm0, %v263_v40 }
 0x1b2   :  { %2055 = vmatmul.mubr.msk.f32.vlgmr.msra.gmra.mxu1 %vm93_vm0, %v264_v41  ;;  %vm2697_vm0 = vcmp.eq.s32.totalorder %v519_v33, 0 }
 0x1b3   :  { %vm521_vm2 = vmxor %vm2666_vm11, %vm2697_vm0 }
 0x1b4   :  { %vm522_vm3 = vmxor %vm521_vm2, %vm2516_vm9 }
 0x1b5   :  { %vm543_vm4 = vmxor %vm2648_vm7, %vm2697_vm0 }
 0x1b6   :  { %vm544_vm8 = vmxor %vm543_vm4, %vm2516_vm9 }
 0x272   :  { %v2056_v42 = vpop.f32.mrf.mxu1 }
 0x273   :  { %2057 = vmatprep.subr.mxu0 %v2056_v42 }
 0x274   :  { %v341_v43 = vpop.f32.mrf.mxu1  ;;  %2058 = vmatpush3.msra.mxu0 %v2056_v42 }
 0x275   :  { %2059 = vmatprep.subr.mxu0 %v341_v43 }
 0x276   :  { %2060 = vmatpush3.msra.mxu0 %v341_v43 }
 0x277   :  { %2062 = vmatmul.mubr.msk.f32.vlgmr.msra.gmra.mxu0 %vm60_vm1, %v86_v30 }
 0x337   :  { %v2063_v47 = vpop.f32.mrf.mxu0 }
 0x338   :  { %v2623_v48 = vadd.f32 %v2063_v47, %v1823_v45 }
 0x339   :  { %v423_v49 = vpop.f32.mrf.mxu0 }
 0x33a   :  { %v433_v50 = vmax.f32 %v2623_v48, 0.0  ;;  %v2627_v51 = vadd.f32 %v1823_v45, %v423_v49 }
 0x33c   :  { %v440_v52 = vsel %vm436_vm5, %v433_v50, 3e+38  ;;  %v432_v53 = vmax.f32 %v2627_v51, 0.0 }
 0x33d   :  { %443 = vrot.lane.b32.xlu1 %v440_v52, %s2514_s5 }
 0x33e   :  { %v439_v54 = vsel %vm436_vm5, %v432_v53, 3e+38 }
 0x33f   :  { %441 = vrot.lane.b32.xlu0 %v439_v54, %s2514_s5 }
 0x341   :  { %447 = vrot.lane.b32.xlu1 %v440_v52, %s2515_s10 }
 0x345   :  { %445 = vrot.lane.b32.xlu1 %v439_v54, %s2515_s10 }
 0x3af   :  { %v444_v59 = vpop.permute.xlu1 %443 }
 0x3b1   :  { %v442_v0 = vpop.permute.xlu0 %441 }
 0x3b3   :  { %v448_v60 = vpop.permute.xlu1 %447 }
 0x3b4   :  { %v458_v61 = vsel %vm2644_vm6, %v444_v59, %v448_v60 }
 0x3b5   :  { %v460_v62 = vmin.f32 %v440_v52, %v458_v61  ;;  %v462_v63 = vmax.f32 %v440_v52, %v458_v61 }
 0x3b7   :  { %v446_v1 = vpop.permute.xlu1 %445  ;;  %v466_v2 = vsel %vm454_vm10, %v460_v62, %v462_v63 }
 0x3b8   :  { %v457_v3 = vsel %vm2644_vm6, %v442_v0, %v446_v1  ;;  %469 = vrot.lane.b32.xlu1 %v466_v2, %s2517_s11 }
 0x3b9   :  { %v459_v4 = vmin.f32 %v439_v54, %v457_v3  ;;  %v461_v5 = vmax.f32 %v439_v54, %v457_v3 }
 0x3bb   :  { %v465_v6 = vsel %vm454_vm10, %v459_v4, %v461_v5  ;;  %vm563_vm10 = vmxor %vm2644_vm6, %vm2697_vm0 }
 0x3bc   :  { %473 = vrot.lane.b32.xlu1 %v466_v2, %s2518_s12  ;;  %vm564_vm12 = vmxor %vm563_vm10, %vm2516_vm9 }
 0x3c0   :  { %467 = vrot.lane.b32.xlu1 %v465_v6, %s2517_s11 }
 0x3c4   :  { %471 = vrot.lane.b32.xlu1 %v465_v6, %s2518_s12 }
 0x42a   :  { %v470_v9 = vpop.permute.xlu1 %469 }
 0x42e   :  { %v474_v10 = vpop.permute.xlu1 %473 }
 0x42f   :  { %v482_v11 = vsel %vm2648_vm7, %v470_v9, %v474_v10 }
 0x430   :  { %v484_v12 = vmin.f32 %v466_v2, %v482_v11  ;;  %v486_v13 = vmax.f32 %v466_v2, %v482_v11 }
 0x432   :  { %v468_v14 = vpop.permute.xlu1 %467  ;;  %v490_v15 = vsel %vm478_vm13, %v484_v12, %v486_v13 }
 0x433   :  { %497 = vrot.lane.b32.xlu0 %v490_v15, %s2515_s10  ;;  %493 = vrot.lane.b32.xlu1 %v490_v15, %s2514_s5 }
 0x436   :  { %v472_v16 = vpop.permute.xlu1 %471 }
 0x437   :  { %v481_v17 = vsel %vm2648_vm7, %v468_v14, %v472_v16  ;;  %v583_v16 = vand.u32 16, %v2621_v46 }
 0x438   :  { %v483_v18 = vmin.f32 %v465_v6, %v481_v17  ;;  %v485_v19 = vmax.f32 %v465_v6, %v481_v17 }
 0x43a   :  { %v489_v20 = vsel %vm478_vm13, %v483_v18, %v485_v19  ;;  %vm2741_vm13 = vcmp.eq.s32.totalorder %v583_v16, 0 }
 0x43b   :  { %495 = vrot.lane.b32.xlu0 %v489_v20, %s2515_s10  ;;  %491 = vrot.lane.b32.xlu1 %v489_v20, %s2514_s5  ;;  %vm585_vm14 = vmxor %vm2697_vm0, %vm2741_vm13 }
 0x43c   :  { %vm607_vm2 = vmxor %vm2666_vm11, %vm2741_vm13 }
 0x43d   :  { %vm627_vm4 = vmxor %vm2648_vm7, %vm2741_vm13 }
 0x43e   :  { %vm647_vm10 = vmxor %vm2644_vm6, %vm2741_vm13 }
 0x4a5   :  { %v494_v21 = vpop.permute.xlu1 %493  ;;  %v498_v22 = vpop.permute.xlu0 %497 }
 0x4a6   :  { %v502_v23 = vsel %vm2644_vm6, %v494_v21, %v498_v22 }
 0x4a7   :  { %v504_v24 = vmin.f32 %v490_v15, %v502_v23  ;;  %v506_v25 = vmax.f32 %v490_v15, %v502_v23 }
 0x4a9   :  { %v510_v26 = vsel %vm500_vm15, %v504_v24, %v506_v25 }
 0x4aa   :  { %517 = vrot.lane.b32.xlu0 %v510_v26, %s2519_s13  ;;  %513 = vrot.lane.b32.xlu1 %v510_v26, %s2520_s14 }
 0x4ad   :  { %v492_v27 = vpop.permute.xlu1 %491  ;;  %v496_v28 = vpop.permute.xlu0 %495 }
 0x4ae   :  { %v501_v29 = vsel %vm2644_vm6, %v492_v27, %v496_v28 }
 0x4af   :  { %v503_v30 = vmin.f32 %v489_v20, %v501_v29  ;;  %v505_v31 = vmax.f32 %v489_v20, %v501_v29 }
 0x4b1   :  { %v509_v32 = vsel %vm500_vm15, %v503_v30, %v505_v31  ;;  %vm586_vm15 = vmxor %vm585_vm14, %vm2516_vm9 }
 0x4b2   :  { %515 = vrot.lane.b32.xlu0 %v509_v32, %s2519_s13  ;;  %511 = vrot.lane.b32.xlu1 %v509_v32, %s2520_s14 }
 0x51c   :  { %v514_v35 = vpop.permute.xlu1 %513  ;;  %v518_v36 = vpop.permute.xlu0 %517 }
 0x51d   :  { %v526_v37 = vsel %vm2666_vm11, %v514_v35, %v518_v36 }
 0x51e   :  { %v528_v38 = vmin.f32 %v510_v26, %v526_v37  ;;  %v530_v39 = vmax.f32 %v510_v26, %v526_v37 }
 0x520   :  { %v534_v40 = vsel %vm522_vm3, %v528_v38, %v530_v39 }
 0x521   :  { %541 = vrot.lane.b32.xlu0 %v534_v40, %s2518_s12  ;;  %537 = vrot.lane.b32.xlu1 %v534_v40, %s2517_s11 }
 0x524   :  { %v512_v41 = vpop.permute.xlu1 %511  ;;  %v516_v42 = vpop.permute.xlu0 %515 }
 0x525   :  { %v525_v43 = vsel %vm2666_vm11, %v512_v41, %v516_v42 }
 0x526   :  { %v527_v45 = vmin.f32 %v509_v32, %v525_v43  ;;  %v529_v47 = vmax.f32 %v509_v32, %v525_v43 }
 0x528   :  { %v533_v49 = vsel %vm522_vm3, %v527_v45, %v529_v47  ;;  %vm608_vm3 = vmxor %vm607_vm2, %vm2516_vm9 }
 0x529   :  { %539 = vrot.lane.b32.xlu0 %v533_v49, %s2518_s12  ;;  %535 = vrot.lane.b32.xlu1 %v533_v49, %s2517_s11 }
 0x593   :  { %v538_v52 = vpop.permute.xlu1 %537  ;;  %v542_v54 = vpop.permute.xlu0 %541 }
 0x594   :  { %v546_v55 = vsel %vm2648_vm7, %v538_v52, %v542_v54 }
 0x595   :  { %v548_v56 = vmin.f32 %v534_v40, %v546_v55  ;;  %v550_v59 = vmax.f32 %v534_v40, %v546_v55 }
 0x597   :  { %v554_v60 = vsel %vm544_vm8, %v548_v56, %v550_v59 }
 0x598   :  { %561 = vrot.lane.b32.xlu0 %v554_v60, %s2515_s10  ;;  %557 = vrot.lane.b32.xlu1 %v554_v60, %s2514_s5 }
 0x59b   :  { %v536_v61 = vpop.permute.xlu1 %535  ;;  %v540_v62 = vpop.permute.xlu0 %539 }
 0x59c   :  { %v545_v63 = vsel %vm2648_vm7, %v536_v61, %v540_v62 }
 0x59d   :  { %v547_v0 = vmin.f32 %v533_v49, %v545_v63  ;;  %v549_v1 = vmax.f32 %v533_v49, %v545_v63 }
 0x59f   :  { %v553_v2 = vsel %vm544_vm8, %v547_v0, %v549_v1  ;;  %vm628_vm8 = vmxor %vm627_vm4, %vm2516_vm9 }
 0x5a0   :  { %559 = vrot.lane.b32.xlu0 %v553_v2, %s2515_s10  ;;  %555 = vrot.lane.b32.xlu1 %v553_v2, %s2514_s5 }
 0x60a   :  { %v558_v3 = vpop.permute.xlu1 %557  ;;  %v562_v4 = vpop.permute.xlu0 %561 }
 0x60b   :  { %v566_v5 = vsel %vm2644_vm6, %v558_v3, %v562_v4 }
 0x60c   :  { %v568_v6 = vmin.f32 %v554_v60, %v566_v5  ;;  %v570_v7 = vmax.f32 %v554_v60, %v566_v5 }
 0x60e   :  { %v574_v9 = vsel %vm564_vm12, %v568_v6, %v570_v7 }
 0x60f   :  { %581 = vrot.lane.b32.xlu0 %v574_v9, %s2512_s9  ;;  %577 = vrot.lane.b32.xlu1 %v574_v9, %s2521_s15 }
 0x612   :  { %v556_v10 = vpop.permute.xlu1 %555  ;;  %v560_v11 = vpop.permute.xlu0 %559 }
 0x613   :  { %v565_v12 = vsel %vm2644_vm6, %v556_v10, %v560_v11 }
 0x614   :  { %v567_v13 = vmin.f32 %v553_v2, %v565_v12  ;;  %v569_v14 = vmax.f32 %v553_v2, %v565_v12  ;;  %v667_v12 = vand.u32 32, %v2621_v46 }
 0x616   :  { %v573_v15 = vsel %vm564_vm12, %v567_v13, %v569_v14  ;;  %vm648_vm12 = vmxor %vm647_vm10, %vm2516_vm9  ;;  %vm2794_vm14 = vcmp.eq.s32.totalorder %v667_v12, 0  ;;  %v908_v12 = vld [vmem:[#allocation5 + $0x30] sm:$0xff] }
 0x617   :  { %579 = vrot.lane.b32.xlu0 %v573_v15, %s2512_s9  ;;  %575 = vrot.lane.b32.xlu1 %v573_v15, %s2521_s15 }
 0x681   :  { %v578_v18 = vpop.permute.xlu1 %577  ;;  %v582_v19 = vpop.permute.xlu0 %581 }
 0x682   :  { %v590_v20 = vsel %vm2697_vm0, %v578_v18, %v582_v19 }
 0x683   :  { %v592_v21 = vmin.f32 %v574_v9, %v590_v20  ;;  %v594_v22 = vmax.f32 %v574_v9, %v590_v20 }
 0x685   :  { %v598_v23 = vsel %vm586_vm15, %v592_v21, %v594_v22 }
 0x686   :  { %605 = vrot.lane.b32.xlu0 %v598_v23, %s2519_s13  ;;  %601 = vrot.lane.b32.xlu1 %v598_v23, %s2520_s14 }
 0x689   :  { %v576_v24 = vpop.permute.xlu1 %575  ;;  %v580_v25 = vpop.permute.xlu0 %579 }
 0x68a   :  { %v589_v26 = vsel %vm2697_vm0, %v576_v24, %v580_v25 }
 0x68b   :  { %v591_v27 = vmin.f32 %v573_v15, %v589_v26  ;;  %v593_v28 = vmax.f32 %v573_v15, %v589_v26 }
 0x68d   :  { %v597_v29 = vsel %vm586_vm15, %v591_v27, %v593_v28  ;;  %vm669_vm15 = vmxor %vm2741_vm13, %vm2794_vm14 }
 0x68e   :  { %603 = vrot.lane.b32.xlu0 %v597_v29, %s2519_s13  ;;  %599 = vrot.lane.b32.xlu1 %v597_v29, %s2520_s14  ;;  %vm670_vm2 = vmxor %vm669_vm15, %vm2516_vm9 }
 0x6f8   :  { %v602_v30 = vpop.permute.xlu1 %601  ;;  %v606_v31 = vpop.permute.xlu0 %605 }
 0x6f9   :  { %v610_v32 = vsel %vm2666_vm11, %v602_v30, %v606_v31 }
 0x6fa   :  { %v612_v33 = vmin.f32 %v598_v23, %v610_v32  ;;  %v614_v35 = vmax.f32 %v598_v23, %v610_v32 }
 0x6fc   :  { %v618_v36 = vsel %vm608_vm3, %v612_v33, %v614_v35 }
 0x6fd   :  { %625 = vrot.lane.b32.xlu0 %v618_v36, %s2518_s12  ;;  %621 = vrot.lane.b32.xlu1 %v618_v36, %s2517_s11 }
 0x700   :  { %v600_v37 = vpop.permute.xlu1 %599  ;;  %v604_v38 = vpop.permute.xlu0 %603 }
 0x701   :  { %v609_v39 = vsel %vm2666_vm11, %v600_v37, %v604_v38 }
 0x702   :  { %v611_v40 = vmin.f32 %v597_v29, %v609_v39  ;;  %v613_v41 = vmax.f32 %v597_v29, %v609_v39 }
 0x704   :  { %v617_v42 = vsel %vm608_vm3, %v611_v40, %v613_v41  ;;  %vm691_vm3 = vmxor %vm2697_vm0, %vm2794_vm14 }
 0x705   :  { %623 = vrot.lane.b32.xlu0 %v617_v42, %s2518_s12  ;;  %619 = vrot.lane.b32.xlu1 %v617_v42, %s2517_s11  ;;  %vm692_vm4 = vmxor %vm691_vm3, %vm2516_vm9 }
 0x76f   :  { %v622_v43 = vpop.permute.xlu1 %621  ;;  %v626_v45 = vpop.permute.xlu0 %625 }
 0x770   :  { %v630_v47 = vsel %vm2648_vm7, %v622_v43, %v626_v45 }
 0x771   :  { %v632_v49 = vmin.f32 %v618_v36, %v630_v47  ;;  %v634_v52 = vmax.f32 %v618_v36, %v630_v47 }
 0x773   :  { %v638_v54 = vsel %vm628_vm8, %v632_v49, %v634_v52 }
 0x774   :  { %645 = vrot.lane.b32.xlu0 %v638_v54, %s2515_s10  ;;  %641 = vrot.lane.b32.xlu1 %v638_v54, %s2514_s5 }
 0x777   :  { %v620_v55 = vpop.permute.xlu1 %619  ;;  %v624_v56 = vpop.permute.xlu0 %623 }
 0x778   :  { %v629_v59 = vsel %vm2648_vm7, %v620_v55, %v624_v56  ;;  %v2524_v56 = vmov 0.0  }
 0x779   :  { %v631_v60 = vmin.f32 %v617_v42, %v629_v59  ;;  %v633_v61 = vmax.f32 %v617_v42, %v629_v59  ;;  %2071 = vmatprep.subr.mxu1 %v2524_v56 }
 0x77b   :  { %v637_v62 = vsel %vm628_vm8, %v631_v60, %v633_v61  ;;  %v917_v61 = vld [vmem:[#allocation5 + $0x78] sm:$0xff] }
 0x77c   :  { %643 = vrot.lane.b32.xlu0 %v637_v62, %s2515_s10  ;;  %639 = vrot.lane.b32.xlu1 %v637_v62, %s2514_s5 }
 0x77d   :  { %2072 = vmatpush3.msra.mxu1 %v917_v61 }
 0x77e   :  { %2073 = vmatprep.subr.mxu1 %v2524_v56 }
 0x7e6   :  { %v642_v63 = vpop.permute.xlu1 %641  ;;  %v646_v0 = vpop.permute.xlu0 %645 }
 0x7e7   :  { %v650_v1 = vsel %vm2644_vm6, %v642_v63, %v646_v0 }
 0x7e8   :  { %v652_v2 = vmin.f32 %v638_v54, %v650_v1  ;;  %v654_v3 = vmax.f32 %v638_v54, %v650_v1  ;;  %v915_v1 = vld [vmem:[#allocation5 + $0x68] sm:$0xff] }
 0x7ea   :  { %v658_v4 = vsel %vm648_vm12, %v652_v2, %v654_v3 }
 0x7eb   :  { %665 = vrot.lane.b32.xlu0 %v658_v4, %s2522_s16  ;;  %661 = vrot.lane.b32.xlu1 %v658_v4, %s2523_s4 }
 0x7ee   :  { %v640_v5 = vpop.permute.xlu1 %639  ;;  %v644_v6 = vpop.permute.xlu0 %643 }
 0x7ef   :  { %v649_v7 = vsel %vm2644_vm6, %v640_v5, %v644_v6  ;;  %v914_v5 = vld [vmem:[#allocation5 + $0x60] sm:$0xff] }
 0x7f0   :  { %v651_v9 = vmin.f32 %v637_v62, %v649_v7  ;;  %v653_v10 = vmax.f32 %v637_v62, %v649_v7  ;;  %v916_v62 = vld [vmem:[#allocation5 + $0x70] sm:$0xff] }
 0x7f1   :  { %2074 = vmatpush3.msra.mxu1 %v916_v62  ;;  %v912_v7 = vld [vmem:[#allocation5 + $0x50] sm:$0xff] }
 0x7f2   :  { %v657_v11 = vsel %vm648_vm12, %v651_v9, %v653_v10  ;;  %2075 = vmatprep.subr.mxu1 %v2524_v56  ;;  %v911_v9 = vld [vmem:[#allocation5 + $0x48] sm:$0xff]  ;;  %v910_v10 = vld [vmem:[#allocation5 + $0x40] sm:$0xff] }
 0x7f3   :  { %663 = vrot.lane.b32.xlu0 %v657_v11, %s2522_s16  ;;  %659 = vrot.lane.b32.xlu1 %v657_v11, %s2523_s4 }
 0x7f4   :  { %2076 = vmatpush3.msra.mxu1 %v915_v1 }
 0x7f5   :  { %2077 = vmatprep.subr.mxu1 %v2524_v56 }
 0x7f6   :  { %2078 = vmatpush3.msra.mxu1 %v914_v5  ;;  %v1002_v5 = vld [vmem:[#allocation5 + $0xe0] sm:$0xff] }
 0x7f7   :  { %2079 = vmatprep.subr.mxu1 %v2524_v56 }
 0x7f8   :  { %2080 = vmatpush3.msra.mxu1 %v913_v58  ;;  %v999_v58 = vld [vmem:[#allocation5 + $0xc8] sm:$0xff] }
 0x7f9   :  { %2081 = vmatprep.subr.mxu1 %v2524_v56 }
 0x7fa   :  { %2082 = vmatpush3.msra.mxu1 %v912_v7  ;;  %v998_v7 = vld [vmem:[#allocation5 + $0xc0] sm:$0xff] }
 0x7fb   :  { %2083 = vmatprep.subr.mxu1 %v2524_v56 }
 0x7fc   :  { %2084 = vmatpush3.msra.mxu1 %v911_v9  ;;  %v997_v9 = vld [vmem:[#allocation5 + $0xb8] sm:$0xff] }
 0x7fd   :  { %2085 = vmatprep.subr.mxu1 %v2524_v56 }
 0x7fe   :  { %2086 = vmatpush3.msra.mxu1 %v910_v10  ;;  %v996_v10 = vld [vmem:[#allocation5 + $0xb0] sm:$0xff] }
 0x7ff   :  { %2087 = vmatprep.subr.mxu1 %v2524_v56 }
 0x85d   :  { %v662_v14 = vpop.permute.xlu1 %661  ;;  %v666_v15 = vpop.permute.xlu0 %665 }
 0x85e   :  { %v674_v16 = vsel %vm2741_vm13, %v662_v14, %v666_v15  ;;  %v907_v14 = vld [vmem:[#allocation5 + $0x28] sm:$0xff]  ;;  %v906_v15 = vld [vmem:[#allocation5 + $0x20] sm:$0xff] }
 0x85f   :  { %v676_v18 = vmin.f32 %v658_v4, %v674_v16  ;;  %v678_v19 = vmax.f32 %v658_v4, %v674_v16  ;;  %v905_v16 = vld [vmem:[#allocation5 + $0x18] sm:$0xff] }
 0x861   :  { %v682_v20 = vsel %vm670_vm2, %v676_v18, %v678_v19  ;;  %v904_v18 = vld [vmem:[#allocation5 + $0x10] sm:$0xff]  ;;  %v903_v19 = vld [vmem:[#allocation5 + $0x8] sm:$0xff] }
 0x862   :  { %689 = vrot.lane.b32.xlu0 %v682_v20, %s2512_s9  ;;  %685 = vrot.lane.b32.xlu1 %v682_v20, %s2521_s15 }
 0x865   :  { %v660_v21 = vpop.permute.xlu1 %659  ;;  %v664_v22 = vpop.permute.xlu0 %663 }
 0x866   :  { %v673_v23 = vsel %vm2741_vm13, %v660_v21, %v664_v22  ;;  %vm711_vm13 = vmxor %vm2666_vm11, %vm2794_vm14 }
 0x867   :  { %v675_v24 = vmin.f32 %v657_v11, %v673_v23  ;;  %v677_v25 = vmax.f32 %v657_v11, %v673_v23  ;;  %vm712_vm8 = vmxor %vm711_vm13, %vm2516_vm9  ;;  %v909_v11 = vld [vmem:[#allocation5 + $0x38] sm:$0xff] }
 0x868   :  { %2088 = vmatpush3.msra.mxu1 %v909_v11  ;;  %v995_v11 = vld [vmem:[#allocation5 + $0xa8] sm:$0xff] }
 0x869   :  { %v681_v26 = vsel %vm670_vm2, %v675_v24, %v677_v25  ;;  %2089 = vmatprep.subr.mxu1 %v2524_v56 }
 0x86a   :  { %687 = vrot.lane.b32.xlu0 %v681_v26, %s2512_s9  ;;  %683 = vrot.lane.b32.xlu1 %v681_v26, %s2521_s15 }
 0x86b   :  { %2090 = vmatpush3.msra.mxu1 %v908_v12  ;;  %v994_v12 = vld [vmem:[#allocation5 + $0xa0] sm:$0xff] }
 0x86c   :  { %2091 = vmatprep.subr.mxu1 %v2524_v56 }
 0x86d   :  { %2092 = vmatpush3.msra.mxu1 %v907_v14  ;;  %v993_v14 = vld [vmem:[#allocation5 + $0x98] sm:$0xff] }
 0x86e   :  { %2093 = vmatprep.subr.mxu1 %v2524_v56 }
 0x86f   :  { %2094 = vmatpush3.msra.mxu1 %v906_v15  ;;  %v992_v15 = vld [vmem:[#allocation5 + $0x90] sm:$0xff] }
 0x870   :  { %2095 = vmatprep.subr.mxu1 %v2524_v56 }
 0x871   :  { %2096 = vmatpush3.msra.mxu1 %v905_v16  ;;  %v902_v16 = vld [vmem:[#allocation5] sm:$0xff] }
 0x872   :  { %2097 = vmatprep.subr.mxu1 %v2524_v56 }
 0x873   :  { %2098 = vmatpush3.msra.mxu1 %v904_v18  ;;  %v991_v18 = vld [vmem:[#allocation5 + $0x88] sm:$0xff] }
 0x874   :  { %2099 = vmatprep.subr.mxu1 %v2524_v56 }
 0x875   :  { %2100 = vmatpush3.msra.mxu1 %v903_v19  ;;  %v990_v19 = vld [vmem:[#allocation5 + $0x80] sm:$0xff] }
 0x876   :  { %2101 = vmatprep.subr.mxu1 %v2524_v56 }
 0x877   :  { %2102 = vmatpush3.msra.mxu1 %v902_v16  ;;  %v1264_v16 = vld [vmem:[#allocation5 + $0x218] sm:$0xff] }
 0x878   :  { %2141 = vmatprep.subr.mxu1 %v2524_v56 }
 0x8d4   :  { %v686_v27 = vpop.permute.xlu1 %685  ;;  %v690_v28 = vpop.permute.xlu0 %689 }
 0x8d5   :  { %v694_v29 = vsel %vm2697_vm0, %v686_v27, %v690_v28 }
 0x8d6   :  { %v696_v17 = vmin.f32 %v682_v20, %v694_v29  ;;  %v698_v30 = vmax.f32 %v682_v20, %v694_v29  ;;  %v770_v20 = vshrl.u32 %v434_v44, 7 }
 0x8d8   :  { %v702_v31 = vsel %vm692_vm4, %v696_v17, %v698_v30  ;;  %v771_v21 = vadd.s32 8, %v770_v20  ;;  %vm772_vm10 = vcmp.eq.s32.totalorder %v770_v20, %v2621_v46  ;;  %vm789_vm12 = vcmp.lt.s32.totalorder %v770_v20, %v2621_v46 }
 0x8d9   :  { %709 = vrot.lane.b32.xlu0 %v702_v31, %s2519_s13  ;;  %705 = vrot.lane.b32.xlu1 %v702_v31, %s2520_s14 }
 0x8da   :  { %vm790_vm15 = vcmp.lt.s32.totalorder %v771_v21, %v2621_v46 }
 0x8dc   :  { %v684_v32 = vpop.permute.xlu1 %683  ;;  %v688_v33 = vpop.permute.xlu0 %687 }
 0x8dd   :  { %v693_v35 = vsel %vm2697_vm0, %v684_v32, %v688_v33 }
 0x8de   :  { %v695_v36 = vmin.f32 %v681_v26, %v693_v35  ;;  %v697_v37 = vmax.f32 %v681_v26, %v693_v35 }
 0x8e0   :  { %v701_v38 = vsel %vm692_vm4, %v695_v36, %v697_v37 }
 0x8e1   :  { %707 = vrot.lane.b32.xlu0 %v701_v38, %s2519_s13  ;;  %703 = vrot.lane.b32.xlu1 %v701_v38, %s2520_s14 }
 0x94b   :  { %v706_v39 = vpop.permute.xlu1 %705  ;;  %v710_v40 = vpop.permute.xlu0 %709 }
 0x94c   :  { %v714_v41 = vsel %vm2666_vm11, %v706_v39, %v710_v40 }
 0x94d   :  { %v716_v34 = vmin.f32 %v702_v31, %v714_v41  ;;  %v718_v42 = vmax.f32 %v702_v31, %v714_v41 }
 0x94f   :  { %v722_v43 = vsel %vm712_vm8, %v716_v34, %v718_v42 }
 0x950   :  { %729 = vrot.lane.b32.xlu0 %v722_v43, %s2518_s12  ;;  %725 = vrot.lane.b32.xlu1 %v722_v43, %s2517_s11 }
 0x953   :  { %v704_v45 = vpop.permute.xlu1 %703  ;;  %v708_v47 = vpop.permute.xlu0 %707 }
 0x954   :  { %v713_v49 = vsel %vm2666_vm11, %v704_v45, %v708_v47  ;;  %vm731_vm11 = vmxor %vm2648_vm7, %vm2794_vm14 }
 0x955   :  { %v715_v52 = vmin.f32 %v701_v38, %v713_v49  ;;  %v717_v54 = vmax.f32 %v701_v38, %v713_v49  ;;  %vm2849_vm0 = vmxor %vm731_vm11, %vm2516_vm9 }
 0x957   :  { %v721_v55 = vsel %vm712_vm8, %v715_v52, %v717_v54  ;;  %v809_v54 = vcvt.s32.f32 %v771_v21 }
 0x958   :  { %727 = vrot.lane.b32.xlu0 %v721_v55, %s2518_s12  ;;  %723 = vrot.lane.b32.xlu1 %v721_v55, %s2517_s11 }
 0x977   :  { %767 = vmax.xlane.f32.xlu0 %v433_v50 }
 0x97c   :  { %765 = vmax.xlane.f32.xlu1 %v432_v53 }
 0x9c2   :  { %v726_v8 = vpop.permute.xlu1 %725  ;;  %v730_v59 = vpop.permute.xlu0 %729 }
 0x9c3   :  { %v734_v60 = vsel %vm2648_vm7, %v726_v8, %v730_v59 }
 0x9c4   :  { %v736_v50 = vmin.f32 %v722_v43, %v734_v60  ;;  %v738_v51 = vmax.f32 %v722_v43, %v734_v60  ;;  %v808_v43 = vcvt.s32.f32 %v770_v20 }
 0x9c6   :  { %v2855_v53 = vsel %vm2849_vm0, %v736_v50, %v738_v51 }
 0x9c7   :  { %749 = vrot.lane.b32.xlu1 %v2855_v53, %s2515_s10  ;;  %745 = vrot.lane.b32.xlu0 %v2855_v53, %s2514_s5 }
 0x9ca   :  { %v724_v63 = vpop.permute.xlu1 %723  ;;  %v728_v0 = vpop.permute.xlu0 %727 }
 0x9cb   :  { %v733_v2 = vsel %vm2648_vm7, %v724_v63, %v728_v0  ;;  %vm773_vm7 = vcmp.eq.s32.totalorder %v771_v21, %v2621_v46  ;;  %v1001_v46 = vld [vmem:[#allocation5 + $0xd8] sm:$0xff] }
 0x9cc   :  { %v735_v3 = vmin.f32 %v721_v55, %v733_v2  ;;  %v737_v4 = vmax.f32 %v721_v55, %v733_v2  ;;  %v1005_v2 = vld [vmem:[#allocation5 + $0xf8] sm:$0xff] }
 0x9cd   :  { %v1096_v21 = vld [vmem:[#allocation5 + $0x178] sm:$0xff] }
 0x9ce   :  { %v2867_v6 = vsel %vm2849_vm0, %v735_v3, %v737_v4  ;;  %v1003_v4 = vld [vmem:[#allocation5 + $0xe8] sm:$0xff] }
 0x9cf   :  { %747 = vrot.lane.b32.xlu0 %v2867_v6, %s2515_s10  ;;  %743 = vrot.lane.b32.xlu1 %v2867_v6, %s2514_s5 }
 0xa00   :  { %v768_v22 = vpop.xlane.xlu0 %767 }
 0xa01   :  { %v775_v23 = vsel %vm773_vm7, %v768_v22, -3e+38 }
 0xa02   :  { %v777_v26 = vsel %vm60_vm1, %v775_v23, -inf }
 0xa05   :  { %v766_v24 = vpop.xlane.xlu1 %765 }
 0xa06   :  { %v774_v25 = vsel %vm772_vm10, %v766_v24, -3e+38 }
 0xa07   :  { %v776_v27 = vsel %vm60_vm1, %v774_v25, -inf  ;;  %v1186_v25 = vld [vmem:[#allocation5 + $0x1f8] sm:$0xff] }
 0xa08   :  { %v778_v28 = vmax.f32 %v776_v27, %v777_v26  ;;  %v1094_v26 = vld [vmem:[#allocation5 + $0x168] sm:$0xff]  ;;  %v1185_v27 = vld [vmem:[#allocation5 + $0x1f0] sm:$0xff] }
 0xa0a   :  { %v779_v29 = vrot.slane %v778_v28, 4 }
 0xa0c   :  { %v780_v17 = vmax.f32 %v778_v28, %v779_v29  ;;  %v1093_v28 = vld [vmem:[#allocation5 + $0x160] sm:$0xff]  ;;  %v1184_v29 = vld [vmem:[#allocation5 + $0x1e8] sm:$0xff] }
 0xa0e   :  { %v781_v30 = vrot.slane %v780_v17, 2 }
 0xa10   :  { %v782_v31 = vmax.f32 %v780_v17, %v781_v30  ;;  %v1092_v17 = vld [vmem:[#allocation5 + $0x158] sm:$0xff]  ;;  %v1183_v30 = vld [vmem:[#allocation5 + $0x1e0] sm:$0xff] }
 0xa12   :  { %v783_v32 = vrot.slane %v782_v31, 1 }
 0xa14   :  { %v784_v44 = vmax.f32 %v782_v31, %v783_v32  ;;  %v1091_v31 = vld [vmem:[#allocation5 + $0x150] sm:$0xff]  ;;  %v1182_v32 = vld [vmem:[#allocation5 + $0x1d8] sm:$0xff] }
 0xa16   :  { %vm785_vm2 = vcmp.gt.f32.partialorder %v766_v24, %v784_v44  ;;  %vm787_vm3 = vcmp.eq.f32.partialorder %v766_v24, %v784_v44  ;;  %vm788_vm4 = vcmp.eq.f32.partialorder %v768_v22, %v784_v44  ;;  %vm786_vm13 = vcmp.gt.f32.partialorder %v768_v22, %v784_v44  ;;  %v1095_v24 = vld [vmem:[#allocation5 + $0x170] sm:$0xff]  ;;  %v1090_v44 = vld [vmem:[#allocation5 + $0x148] sm:$0xff] }
 0xa17   :  { %vm791_vm8 = vmand %vm787_vm3, %vm789_vm12 }
 0xa18   :  { %vm792_vm11 = vmand %vm788_vm4, %vm790_vm15 }
 0xa19   :  { %vm793_vm0 = vmor %vm785_vm2, %vm791_vm8 }
 0xa1a   :  { %vm794_vm7 = vmor %vm786_vm13, %vm792_vm11  ;;  %v1826_v33 = vsel %vm793_vm0, 1.0, %v2524_v56 }
 0xa1b   :  { %v1827_v35 = vsel %vm794_vm7, 1.0, %v2524_v56  ;;  %v799_v36 = vsel %vm60_vm1, %v1826_v33, 0.0  ;;  %vm751_vm12 = vmxor %vm2644_vm6, %vm2794_vm14  ;;  %v1181_v33 = vld [vmem:[#allocation5 + $0x1d0] sm:$0xff] }
 0xa1c   :  { %v800_v37 = vsel %vm60_vm1, %v1827_v35, 0.0  ;;  %vm752_vm15 = vmxor %vm751_vm12, %vm2516_vm9  ;;  %v1089_v35 = vld [vmem:[#allocation5 + $0x140] sm:$0xff] }
 0xa1d   :  { %v801_v38 = vadd.f32 %v800_v37, %v799_v36  ;;  %v1180_v36 = vld [vmem:[#allocation5 + $0x1c8] sm:$0xff]  ;;  %v1088_v37 = vld [vmem:[#allocation5 + $0x138] sm:$0xff] }
 0xa1f   :  { %v802_v39 = vrot.slane %v801_v38, 4 }
 0xa21   :  { %v803_v40 = vadd.f32 %v802_v39, %v801_v38  ;;  %v1179_v38 = vld [vmem:[#allocation5 + $0x1c0] sm:$0xff]  ;;  %v1087_v39 = vld [vmem:[#allocation5 + $0x130] sm:$0xff] }
 0xa23   :  { %v804_v41 = vrot.slane %v803_v40, 2 }
 0xa25   :  { %v805_v34 = vadd.f32 %v804_v41, %v803_v40  ;;  %v1178_v40 = vld [vmem:[#allocation5 + $0x1b8] sm:$0xff]  ;;  %v1086_v41 = vld [vmem:[#allocation5 + $0x128] sm:$0xff] }
 0xa27   :  { %v806_v42 = vrot.slane %v805_v34, 1 }
 0xa29   :  { %v807_v45 = vadd.f32 %v806_v42, %v805_v34  ;;  %v1177_v34 = vld [vmem:[#allocation5 + $0x1b0] sm:$0xff]  ;;  %v1085_v42 = vld [vmem:[#allocation5 + $0x120] sm:$0xff] }
 0xa2b   :  { %v810_v47 = vsub.f32 %v807_v45, %v808_v43  ;;  %v811_v50 = vsub.f32 %v807_v45, %v809_v54  ;;  %v1176_v43 = vld [vmem:[#allocation5 + $0x1a8] sm:$0xff]  ;;  %v1084_v45 = vld [vmem:[#allocation5 + $0x118] sm:$0xff] }
 0xa2c   :  { %v1082_v54 = vld [vmem:[#allocation5 + $0x108] sm:$0xff] }
 0xa2d   :  { %v812_v49 = vand.u32 2147483647, %v810_v47  ;;  %v813_v13 = vand.u32 2147483647, %v811_v50  ;;  %v1175_v47 = vld [vmem:[#allocation5 + $0x1a0] sm:$0xff]  ;;  %v1276_v50 = vld [vmem:[#allocation5 + $0x278] sm:$0xff] }
 0xa2f   :  { %vm814_vm10 = vcmp.lt.f32.partialorder %v812_v49, 0.5  ;;  %vm815_vm9 = vcmp.lt.f32.partialorder %v813_v13, 0.5  ;;  %v1083_v49 = vld [vmem:[#allocation5 + $0x110] sm:$0xff] }
 0xa30   :  { %v1828_v52 = vsel %vm814_vm10, 1.0, %v2524_v56  ;;  %v1829_v3 = vsel %vm815_vm9, 1.0, %v2524_v56  ;;  %v1275_v13 = vld [vmem:[#allocation5 + $0x270] sm:$0xff] }
 0xa31   :  { %2068 = vmatprep.mubr.msk.f32.mxu0 %vm60_vm1, %v1828_v52  ;;  %v1174_v52 = vld [vmem:[#allocation5 + $0x198] sm:$0xff] }
 0xa39   :  { %v750_v55 = vpop.permute.xlu1 %749  ;;  %v746_v8 = vpop.permute.xlu0 %745 }
 0xa3a   :  { %v754_v59 = vsel %vm2644_vm6, %v746_v8, %v750_v55  ;;  %v1173_v55 = vld [vmem:[#allocation5 + $0x190] sm:$0xff]  ;;  %v1081_v8 = vld [vmem:[#allocation5 + $0x100] sm:$0xff] }
 0xa3b   :  { %v756_v60 = vmin.f32 %v2855_v53, %v754_v59  ;;  %v758_v48 = vmax.f32 %v2855_v53, %v754_v59  ;;  %v1172_v59 = vld [vmem:[#allocation5 + $0x188] sm:$0xff] }
 0xa3d   :  { %v762_v51 = vsel %vm752_vm15, %v756_v60, %v758_v48  ;;  %v1171_v48 = vld [vmem:[#allocation5 + $0x180] sm:$0xff] }
 0xa3e   :  { %2064 = vmatprep.subr.msk.mxu0 %vm436_vm5, %v762_v51 }
 0xa3f   :  { %2065 = vmatpush3.msk.msra.mxu0 %vm436_vm5, %v762_v51 }
 0xa41   :  { %v744_v61 = vpop.permute.xlu1 %743  ;;  %v748_v62 = vpop.permute.xlu0 %747 }
 0xa42   :  { %v753_v63 = vsel %vm2644_vm6, %v744_v61, %v748_v62  ;;  %v1366_v61 = vld [vmem:[#allocation5 + $0x2f8] sm:$0xff]  ;;  %v1274_v62 = vld [vmem:[#allocation5 + $0x268] sm:$0xff] }
 0xa43   :  { %v755_v0 = vmin.f32 %v2867_v6, %v753_v63  ;;  %v757_v1 = vmax.f32 %v2867_v6, %v753_v63  ;;  %v1000_v6 = vld [vmem:[#allocation5 + $0xd0] sm:$0xff] }
 0xa44   :  { %v1365_v63 = vld [vmem:[#allocation5 + $0x2f0] sm:$0xff] }
 0xa45   :  { %v761_v53 = vsel %vm752_vm15, %v755_v0, %v757_v1  ;;  %v1273_v0 = vld [vmem:[#allocation5 + $0x260] sm:$0xff]  ;;  %v1364_v1 = vld [vmem:[#allocation5 + $0x2e8] sm:$0xff] }
 0xa46   :  { %2066 = vmatprep.subr.msk.mxu0 %vm436_vm5, %v761_v53 }
 0xa47   :  { %2067 = vmatpush3.msk.msra.mxu0 %vm436_vm5, %v761_v53  ;;  %v1272_v53 = vld [vmem:[#allocation5 + $0x258] sm:$0xff] }
 0xa48   :  { %2069 = vmatmul.mubr.msk.f32.vlgmr.msra.gmra.mxu0 %vm60_vm1, %v1829_v3  ;;  %2106 = vmatprep.subr.mxu0 %v2524_v56  ;;  %vm2525_vm1 = vmmov 0   ;;  %v1271_v3 = vld [vmem:[#allocation5 + $0x250] sm:$0xff] }
 0xa49   :  { %2107 = vmatpush3.msra.mxu0 %v1005_v2  ;;  %2103 = vmatprep.mubr.msk.f32.mxu1 %vm2525_vm1, %v2524_v56  ;;  %v1363_v2 = vld [vmem:[#allocation5 + $0x2e0] sm:$0xff] }
 0xa4a   :  { %2108 = vmatprep.subr.mxu0 %v2524_v56  ;;  %2138 = vmatprep.mubr.msk.f32.mxu0 %vm2525_vm1, %v2524_v56 }
 0xa4b   :  { %2109 = vmatpush3.msra.mxu0 %v1004_v57  ;;  %v1362_v57 = vld [vmem:[#allocation5 + $0x2d8] sm:$0xff] }
 0xa4c   :  { %2110 = vmatprep.subr.mxu0 %v2524_v56 }
 0xa4d   :  { %2111 = vmatpush3.msra.mxu0 %v1003_v4  ;;  %v1270_v4 = vld [vmem:[#allocation5 + $0x248] sm:$0xff] }
 0xa4e   :  { %2112 = vmatprep.subr.mxu0 %v2524_v56 }
 0xa4f   :  { %2113 = vmatpush3.msra.mxu0 %v1002_v5  ;;  %v1361_v5 = vld [vmem:[#allocation5 + $0x2d0] sm:$0xff] }
 0xa50   :  { %2114 = vmatprep.subr.mxu0 %v2524_v56 }
 0xa51   :  { %2115 = vmatpush3.msra.mxu0 %v1001_v46  ;;  %v1269_v46 = vld [vmem:[#allocation5 + $0x240] sm:$0xff] }
 0xa52   :  { %2116 = vmatprep.subr.mxu0 %v2524_v56 }
 0xa53   :  { %2117 = vmatpush3.msra.mxu0 %v1000_v6  ;;  %v1360_v6 = vld [vmem:[#allocation5 + $0x2c8] sm:$0xff] }
 0xa54   :  { %2118 = vmatprep.subr.mxu0 %v2524_v56 }
 0xa55   :  { %2119 = vmatpush3.msra.mxu0 %v999_v58  ;;  %v1268_v58 = vld [vmem:[#allocation5 + $0x238] sm:$0xff] }
 0xa56   :  { %2120 = vmatprep.subr.mxu0 %v2524_v56 }
 0xa57   :  { %2121 = vmatpush3.msra.mxu0 %v998_v7  ;;  %v1359_v7 = vld [vmem:[#allocation5 + $0x2c0] sm:$0xff] }
 0xa58   :  { %2122 = vmatprep.subr.mxu0 %v2524_v56 }
 0xa59   :  { %2123 = vmatpush3.msra.mxu0 %v997_v9  ;;  %v1267_v9 = vld [vmem:[#allocation5 + $0x230] sm:$0xff] }
 0xa5a   :  { %2124 = vmatprep.subr.mxu0 %v2524_v56 }
 0xa5b   :  { %2125 = vmatpush3.msra.mxu0 %v996_v10  ;;  %v1358_v10 = vld [vmem:[#allocation5 + $0x2b8] sm:$0xff] }
 0xa5c   :  { %2126 = vmatprep.subr.mxu0 %v2524_v56 }
 0xa5d   :  { %2127 = vmatpush3.msra.mxu0 %v995_v11  ;;  %v1266_v11 = vld [vmem:[#allocation5 + $0x228] sm:$0xff] }
 0xa5e   :  { %2128 = vmatprep.subr.mxu0 %v2524_v56 }
 0xa5f   :  { %2129 = vmatpush3.msra.mxu0 %v994_v12  ;;  %v1357_v12 = vld [vmem:[#allocation5 + $0x2b0] sm:$0xff] }
 0xa60   :  { %2130 = vmatprep.subr.mxu0 %v2524_v56 }
 0xa61   :  { %2131 = vmatpush3.msra.mxu0 %v993_v14  ;;  %v1265_v14 = vld [vmem:[#allocation5 + $0x220] sm:$0xff] }
 0xa62   :  { %2132 = vmatprep.subr.mxu0 %v2524_v56 }
 0xa63   :  { %2133 = vmatpush3.msra.mxu0 %v992_v15  ;;  %v1356_v15 = vld [vmem:[#allocation5 + $0x2a8] sm:$0xff] }
 0xa64   :  { %2134 = vmatprep.subr.mxu0 %v2524_v56 }
 0xa65   :  { %2135 = vmatpush3.msra.mxu0 %v991_v18  ;;  %v1355_v18 = vld [vmem:[#allocation5 + $0x2a0] sm:$0xff] }
 0xa66   :  { %2136 = vmatprep.subr.mxu0 %v2524_v56 }
 0xa67   :  { %2137 = vmatpush3.msra.mxu0 %v990_v19  ;;  %v1263_v19 = vld [vmem:[#allocation5 + $0x210] sm:$0xff] }
 0xa68   :  { %2176 = vmatprep.subr.mxu0 %v2524_v56 }
 0xb08   :  { %v2944_v20 = vpop.f32.mrf.mxu0 }
 0xb0a   :  { %v2946_v22 = vpop.f32.mrf.mxu0 }
 0xb0b   :  { %2104 = vmatmul.mubr.f32.vlgmr.msra.gmra.mxu1 %v2946_v22  ;;  %v1007_v23 = vrot.slane %v2946_v22, 1  ;;  %v1097_v60 = vrot.slane %v2946_v22, 2  ;;  %v1187_v51 = vrot.slane %v2946_v22, 3 }
 0xb0c   :  { %2142 = vmatpush3.msra.mxu1 %v1096_v21  ;;  %2173 = vmatprep.mubr.msk.f32.mxu1 %vm2525_vm1, %v2524_v56  ;;  %v1354_v21 = vld [vmem:[#allocation5 + $0x298] sm:$0xff] }
 0xb0d   :  { %2143 = vmatprep.subr.mxu1 %v2524_v56  ;;  %2139 = vmatmul.mubr.f32.vlgmr.msra.gmra.mxu0 %v1007_v23  ;;  %v1262_v23 = vld [vmem:[#allocation5 + $0x208] sm:$0xff] }
 0xb0e   :  { %2144 = vmatpush3.msra.mxu1 %v1095_v24  ;;  %2177 = vmatpush3.msra.mxu0 %v1186_v25  ;;  %v1353_v24 = vld [vmem:[#allocation5 + $0x290] sm:$0xff]  ;;  %v1261_v25 = vld [vmem:[#allocation5 + $0x200] sm:$0xff] }
 0xb0f   :  { %2145 = vmatprep.subr.mxu1 %v2524_v56  ;;  %2178 = vmatprep.subr.mxu0 %v2524_v56 }
 0xb10   :  { %2146 = vmatpush3.msra.mxu1 %v1094_v26  ;;  %2179 = vmatpush3.msra.mxu0 %v1185_v27  ;;  %v1352_v26 = vld [vmem:[#allocation5 + $0x288] sm:$0xff]  ;;  %v1277_v27 = vrot.slane %v2946_v22, 4 }
 0xb11   :  { %2147 = vmatprep.subr.mxu1 %v2524_v56  ;;  %2180 = vmatprep.subr.mxu0 %v2524_v56 }
 0xb12   :  { %2148 = vmatpush3.msra.mxu1 %v1093_v28  ;;  %2181 = vmatpush3.msra.mxu0 %v1184_v29  ;;  %v1351_v28 = vld [vmem:[#allocation5 + $0x280] sm:$0xff]  ;;  %v1456_v29 = vld [vmem:[#allocation5 + $0x378] sm:$0xff] }
 0xb13   :  { %2149 = vmatprep.subr.mxu1 %v2524_v56  ;;  %2182 = vmatprep.subr.mxu0 %v2524_v56 }
 0xb14   :  { %2150 = vmatpush3.msra.mxu1 %v1092_v17  ;;  %2183 = vmatpush3.msra.mxu0 %v1183_v30  ;;  %v1367_v17 = vrot.slane %v2946_v22, 5  ;;  %v1455_v30 = vld [vmem:[#allocation5 + $0x370] sm:$0xff] }
 0xb15   :  { %2151 = vmatprep.subr.mxu1 %v2524_v56  ;;  %2184 = vmatprep.subr.mxu0 %v2524_v56 }
 0xb16   :  { %2152 = vmatpush3.msra.mxu1 %v1091_v31  ;;  %2185 = vmatpush3.msra.mxu0 %v1182_v32  ;;  %v1546_v31 = vld [vmem:[#allocation5 + $0x3f8] sm:$0xff]  ;;  %v1454_v32 = vld [vmem:[#allocation5 + $0x368] sm:$0xff] }
 0xb17   :  { %2153 = vmatprep.subr.mxu1 %v2524_v56  ;;  %2186 = vmatprep.subr.mxu0 %v2524_v56 }
 0xb18   :  { %2154 = vmatpush3.msra.mxu1 %v1090_v44  ;;  %2187 = vmatpush3.msra.mxu0 %v1181_v33  ;;  %v1545_v44 = vld [vmem:[#allocation5 + $0x3f0] sm:$0xff]  ;;  %v1453_v33 = vld [vmem:[#allocation5 + $0x360] sm:$0xff] }
 0xb19   :  { %2155 = vmatprep.subr.mxu1 %v2524_v56  ;;  %2188 = vmatprep.subr.mxu0 %v2524_v56 }
 0xb1a   :  { %2156 = vmatpush3.msra.mxu1 %v1089_v35  ;;  %2189 = vmatpush3.msra.mxu0 %v1180_v36  ;;  %v1544_v35 = vld [vmem:[#allocation5 + $0x3e8] sm:$0xff]  ;;  %v1452_v36 = vld [vmem:[#allocation5 + $0x358] sm:$0xff] }
 0xb1b   :  { %2157 = vmatprep.subr.mxu1 %v2524_v56  ;;  %2190 = vmatprep.subr.mxu0 %v2524_v56 }
 0xb1c   :  { %2158 = vmatpush3.msra.mxu1 %v1088_v37  ;;  %2191 = vmatpush3.msra.mxu0 %v1179_v38  ;;  %v1543_v37 = vld [vmem:[#allocation5 + $0x3e0] sm:$0xff]  ;;  %v1451_v38 = vld [vmem:[#allocation5 + $0x350] sm:$0xff] }
 0xb1d   :  { %2159 = vmatprep.subr.mxu1 %v2524_v56  ;;  %2192 = vmatprep.subr.mxu0 %v2524_v56 }
 0xb1e   :  { %2160 = vmatpush3.msra.mxu1 %v1087_v39  ;;  %2193 = vmatpush3.msra.mxu0 %v1178_v40  ;;  %v1542_v39 = vld [vmem:[#allocation5 + $0x3d8] sm:$0xff]  ;;  %v1450_v40 = vld [vmem:[#allocation5 + $0x348] sm:$0xff] }
 0xb1f   :  { %2161 = vmatprep.subr.mxu1 %v2524_v56  ;;  %2194 = vmatprep.subr.mxu0 %v2524_v56 }
 0xb20   :  { %2162 = vmatpush3.msra.mxu1 %v1086_v41  ;;  %2195 = vmatpush3.msra.mxu0 %v1177_v34  ;;  %v1541_v41 = vld [vmem:[#allocation5 + $0x3d0] sm:$0xff]  ;;  %v1449_v34 = vld [vmem:[#allocation5 + $0x340] sm:$0xff] }
 0xb21   :  { %2163 = vmatprep.subr.mxu1 %v2524_v56  ;;  %2196 = vmatprep.subr.mxu0 %v2524_v56 }
 0xb22   :  { %2164 = vmatpush3.msra.mxu1 %v1085_v42  ;;  %2197 = vmatpush3.msra.mxu0 %v1176_v43  ;;  %v1540_v42 = vld [vmem:[#allocation5 + $0x3c8] sm:$0xff]  ;;  %v1448_v43 = vld [vmem:[#allocation5 + $0x338] sm:$0xff] }
 0xb23   :  { %2165 = vmatprep.subr.mxu1 %v2524_v56  ;;  %2198 = vmatprep.subr.mxu0 %v2524_v56 }
 0xb24   :  { %2166 = vmatpush3.msra.mxu1 %v1084_v45  ;;  %2199 = vmatpush3.msra.mxu0 %v1175_v47  ;;  %v1539_v45 = vld [vmem:[#allocation5 + $0x3c0] sm:$0xff]  ;;  %v1447_v47 = vld [vmem:[#allocation5 + $0x330] sm:$0xff] }
 0xb25   :  { %2167 = vmatprep.subr.mxu1 %v2524_v56  ;;  %2200 = vmatprep.subr.mxu0 %v2524_v56 }
 0xb26   :  { %2168 = vmatpush3.msra.mxu1 %v1083_v49  ;;  %2201 = vmatpush3.msra.mxu0 %v1174_v52  ;;  %v1538_v49 = vld [vmem:[#allocation5 + $0x3b8] sm:$0xff]  ;;  %v1446_v52 = vld [vmem:[#allocation5 + $0x328] sm:$0xff] }
 0xb27   :  { %2169 = vmatprep.subr.mxu1 %v2524_v56  ;;  %2202 = vmatprep.subr.mxu0 %v2524_v56 }
 0xb28   :  { %2170 = vmatpush3.msra.mxu1 %v1082_v54  ;;  %2203 = vmatpush3.msra.mxu0 %v1173_v55  ;;  %v1537_v54 = vld [vmem:[#allocation5 + $0x3b0] sm:$0xff]  ;;  %v1445_v55 = vld [vmem:[#allocation5 + $0x320] sm:$0xff] }
 0xb29   :  { %2171 = vmatprep.subr.mxu1 %v2524_v56  ;;  %2204 = vmatprep.subr.mxu0 %v2524_v56 }
 0xb2a   :  { %2172 = vmatpush3.msra.mxu1 %v1081_v8  ;;  %2205 = vmatpush3.msra.mxu0 %v1172_v59  ;;  %v1536_v8 = vld [vmem:[#allocation5 + $0x3a8] sm:$0xff]  ;;  %v1444_v59 = vld [vmem:[#allocation5 + $0x318] sm:$0xff] }
 0xb2b   :  { %2174 = vmatmul.mubr.f32.vlgmr.msra.gmra.mxu1 %v1097_v60  ;;  %2206 = vmatprep.subr.mxu0 %v2524_v56  ;;  %v1535_v60 = vld [vmem:[#allocation5 + $0x3a0] sm:$0xff] }
 0xb2c   :  { %2211 = vmatprep.subr.mxu1 %v2524_v56  ;;  %2207 = vmatpush3.msra.mxu0 %v1171_v48  ;;  %v1443_v48 = vld [vmem:[#allocation5 + $0x310] sm:$0xff] }
 0xb2d   :  { %2208 = vmatprep.mubr.msk.f32.mxu0 %vm2525_vm1, %v2524_v56  ;;  %2212 = vmatpush3.msra.mxu1 %v1276_v50  ;;  %v1534_v50 = vld [vmem:[#allocation5 + $0x398] sm:$0xff] }
 0xb2e   :  { %2209 = vmatmul.mubr.f32.vlgmr.msra.gmra.mxu0 %v1187_v51  ;;  %2213 = vmatprep.subr.mxu1 %v2524_v56  ;;  %v1442_v51 = vld [vmem:[#allocation5 + $0x308] sm:$0xff] }
 0xb2f   :  { %2246 = vmatprep.subr.mxu0 %v2524_v56  ;;  %2214 = vmatpush3.msra.mxu1 %v1275_v13  ;;  %v1533_v13 = vld [vmem:[#allocation5 + $0x390] sm:$0xff] }
 0xb30   :  { %2247 = vmatpush3.msra.mxu0 %v1366_v61  ;;  %2215 = vmatprep.subr.mxu1 %v2524_v56  ;;  %v1441_v61 = vld [vmem:[#allocation5 + $0x300] sm:$0xff] }
 0xb31   :  { %2248 = vmatprep.subr.mxu0 %v2524_v56  ;;  %2216 = vmatpush3.msra.mxu1 %v1274_v62  ;;  %v1532_v62 = vld [vmem:[#allocation5 + $0x388] sm:$0xff] }
 0xb32   :  { %2249 = vmatpush3.msra.mxu0 %v1365_v63  ;;  %2217 = vmatprep.subr.mxu1 %v2524_v56  ;;  %v1457_v63 = vrot.slane %v2946_v22, 6 }
 0xb33   :  { %2250 = vmatprep.subr.mxu0 %v2524_v56  ;;  %2218 = vmatpush3.msra.mxu1 %v1273_v0  ;;  %v1531_v0 = vld [vmem:[#allocation5 + $0x380] sm:$0xff] }
 0xb34   :  { %2251 = vmatpush3.msra.mxu0 %v1364_v1  ;;  %2219 = vmatprep.subr.mxu1 %v2524_v56  ;;  %v1636_v1 = vld [vmem:[#allocation5 + $0x478] sm:$0xff] }
 0xb35   :  { %2252 = vmatprep.subr.mxu0 %v2524_v56  ;;  %2220 = vmatpush3.msra.mxu1 %v1272_v53  ;;  %v1547_v53 = vrot.slane %v2946_v22, 7  ;;  %v1722_v22 = vld [vmem:[#allocation5 + $0x4e8] sm:$0xff] }
 0xb36   :  { %2253 = vmatpush3.msra.mxu0 %v1363_v2  ;;  %2221 = vmatprep.subr.mxu1 %v2524_v56  ;;  %v1635_v2 = vld [vmem:[#allocation5 + $0x470] sm:$0xff] }
 0xb37   :  { %2254 = vmatprep.subr.mxu0 %v2524_v56  ;;  %2222 = vmatpush3.msra.mxu1 %v1271_v3  ;;  %v1724_v3 = vld [vmem:[#allocation5 + $0x4f8] sm:$0xff] }
 0xb38   :  { %2255 = vmatpush3.msra.mxu0 %v1362_v57  ;;  %2223 = vmatprep.subr.mxu1 %v2524_v56  ;;  %v1634_v57 = vld [vmem:[#allocation5 + $0x468] sm:$0xff] }
 0xb39   :  { %2256 = vmatprep.subr.mxu0 %v2524_v56  ;;  %2224 = vmatpush3.msra.mxu1 %v1270_v4  ;;  %v1723_v4 = vld [vmem:[#allocation5 + $0x4f0] sm:$0xff] }
 0xb3a   :  { %2257 = vmatpush3.msra.mxu0 %v1361_v5  ;;  %2225 = vmatprep.subr.mxu1 %v2524_v56  ;;  %v1633_v5 = vld [vmem:[#allocation5 + $0x460] sm:$0xff] }
 0xb3b   :  { %2258 = vmatprep.subr.mxu0 %v2524_v56  ;;  %2226 = vmatpush3.msra.mxu1 %v1269_v46  ;;  %v1632_v46 = vld [vmem:[#allocation5 + $0x458] sm:$0xff] }
 0xb3c   :  { %2259 = vmatpush3.msra.mxu0 %v1360_v6  ;;  %2227 = vmatprep.subr.mxu1 %v2524_v56  ;;  %v1721_v6 = vld [vmem:[#allocation5 + $0x4e0] sm:$0xff] }
 0xb3d   :  { %2260 = vmatprep.subr.mxu0 %v2524_v56  ;;  %2228 = vmatpush3.msra.mxu1 %v1268_v58  ;;  %v1631_v58 = vld [vmem:[#allocation5 + $0x450] sm:$0xff] }
 0xb3e   :  { %2261 = vmatpush3.msra.mxu0 %v1359_v7  ;;  %2229 = vmatprep.subr.mxu1 %v2524_v56  ;;  %v1720_v7 = vld [vmem:[#allocation5 + $0x4d8] sm:$0xff] }
 0xb3f   :  { %2262 = vmatprep.subr.mxu0 %v2524_v56  ;;  %2230 = vmatpush3.msra.mxu1 %v1267_v9  ;;  %v1630_v9 = vld [vmem:[#allocation5 + $0x448] sm:$0xff] }
 0xb40   :  { %2263 = vmatpush3.msra.mxu0 %v1358_v10  ;;  %2231 = vmatprep.subr.mxu1 %v2524_v56  ;;  %v1719_v10 = vld [vmem:[#allocation5 + $0x4d0] sm:$0xff] }
 0xb41   :  { %2264 = vmatprep.subr.mxu0 %v2524_v56  ;;  %2232 = vmatpush3.msra.mxu1 %v1266_v11  ;;  %v1629_v11 = vld [vmem:[#allocation5 + $0x440] sm:$0xff] }
 0xb42   :  { %2265 = vmatpush3.msra.mxu0 %v1357_v12  ;;  %2233 = vmatprep.subr.mxu1 %v2524_v56  ;;  %v1718_v12 = vld [vmem:[#allocation5 + $0x4c8] sm:$0xff] }
 0xb43   :  { %2266 = vmatprep.subr.mxu0 %v2524_v56  ;;  %2234 = vmatpush3.msra.mxu1 %v1265_v14  ;;  %v1628_v14 = vld [vmem:[#allocation5 + $0x438] sm:$0xff] }
 0xb44   :  { %2267 = vmatpush3.msra.mxu0 %v1356_v15  ;;  %2235 = vmatprep.subr.mxu1 %v2524_v56  ;;  %v1717_v15 = vld [vmem:[#allocation5 + $0x4c0] sm:$0xff] }
 0xb45   :  { %2268 = vmatprep.subr.mxu0 %v2524_v56  ;;  %2236 = vmatpush3.msra.mxu1 %v1264_v16  ;;  %v1627_v16 = vld [vmem:[#allocation5 + $0x430] sm:$0xff] }
 0xb46   :  { %2269 = vmatpush3.msra.mxu0 %v1355_v18  ;;  %2237 = vmatprep.subr.mxu1 %v2524_v56  ;;  %v1716_v18 = vld [vmem:[#allocation5 + $0x4b8] sm:$0xff] }
 0xb47   :  { %2270 = vmatprep.subr.mxu0 %v2524_v56  ;;  %2238 = vmatpush3.msra.mxu1 %v1263_v19  ;;  %v1626_v19 = vld [vmem:[#allocation5 + $0x428] sm:$0xff] }
 0xb48   :  { %2271 = vmatpush3.msra.mxu0 %v1354_v21  ;;  %2239 = vmatprep.subr.mxu1 %v2524_v56  ;;  %v1715_v21 = vld [vmem:[#allocation5 + $0x4b0] sm:$0xff] }
 0xb49   :  { %2272 = vmatprep.subr.mxu0 %v2524_v56  ;;  %2240 = vmatpush3.msra.mxu1 %v1262_v23  ;;  %v1625_v23 = vld [vmem:[#allocation5 + $0x420] sm:$0xff] }
 0xb4a   :  { %2273 = vmatpush3.msra.mxu0 %v1353_v24  ;;  %2241 = vmatprep.subr.mxu1 %v2524_v56  ;;  %v1714_v24 = vld [vmem:[#allocation5 + $0x4a8] sm:$0xff] }
 0xb4b   :  { %2274 = vmatprep.subr.mxu0 %v2524_v56  ;;  %2242 = vmatpush3.msra.mxu1 %v1261_v25  ;;  %v1624_v25 = vld [vmem:[#allocation5 + $0x418] sm:$0xff] }
 0xb4c   :  { %2243 = vmatprep.mubr.msk.f32.mxu1 %vm2525_vm1, %v2524_v56  ;;  %2275 = vmatpush3.msra.mxu0 %v1352_v26  ;;  %v1713_v26 = vld [vmem:[#allocation5 + $0x4a0] sm:$0xff] }
 0xb4d   :  { %2244 = vmatmul.mubr.f32.vlgmr.msra.gmra.mxu1 %v1277_v27  ;;  %2276 = vmatprep.subr.mxu0 %v2524_v56  ;;  %v1623_v27 = vld [vmem:[#allocation5 + $0x410] sm:$0xff] }
 0xb4e   :  { %2281 = vmatprep.subr.mxu1 %v2524_v56  ;;  %2277 = vmatpush3.msra.mxu0 %v1351_v28  ;;  %v1712_v28 = vld [vmem:[#allocation5 + $0x498] sm:$0xff] }
 0xb4f   :  { %2278 = vmatprep.mubr.msk.f32.mxu0 %vm2525_vm1, %v2524_v56  ;;  %2282 = vmatpush3.msra.mxu1 %v1456_v29  ;;  %v1622_v29 = vld [vmem:[#allocation5 + $0x408] sm:$0xff] }
 0xb50   :  { %2279 = vmatmul.mubr.f32.vlgmr.msra.gmra.mxu0 %v1367_v17  ;;  %2283 = vmatprep.subr.mxu1 %v2524_v56  ;;  %v1711_v17 = vld [vmem:[#allocation5 + $0x490] sm:$0xff] }
 0xb51   :  { %2316 = vmatprep.subr.mxu0 %v2524_v56  ;;  %2284 = vmatpush3.msra.mxu1 %v1455_v30  ;;  %v1621_v30 = vld [vmem:[#allocation5 + $0x400] sm:$0xff] }
 0xb52   :  { %2317 = vmatpush3.msra.mxu0 %v1546_v31  ;;  %2285 = vmatprep.subr.mxu1 %v2524_v56  ;;  %v1710_v31 = vld [vmem:[#allocation5 + $0x488] sm:$0xff] }
 0xb53   :  { %2318 = vmatprep.subr.mxu0 %v2524_v56  ;;  %2286 = vmatpush3.msra.mxu1 %v1454_v32  ;;  %v1709_v32 = vld [vmem:[#allocation5 + $0x480] sm:$0xff] }
 0xb54   :  { %2319 = vmatpush3.msra.mxu0 %v1545_v44  ;;  %2287 = vmatprep.subr.mxu1 %v2524_v56  ;;  %v1726_v44 = vrot.slane %v2944_v20, 1 }
 0xb55   :  { %2320 = vmatprep.subr.mxu0 %v2524_v56  ;;  %2288 = vmatpush3.msra.mxu1 %v1453_v33  ;;  %v901_v33 = vld [vmem:[%s3113_s7] sm:$0x1]  ;;  %s2526_s7 = smov [#allocation7]  }
 0xb56   :  { %2321 = vmatpush3.msra.mxu0 %v1544_v35  ;;  %2289 = vmatprep.subr.mxu1 %v2524_v56  ;;  %s1806_s18 = sshll.u32 %s2526_s7, 4  ;;  %s1807_s18 = int_to_ptr.vmem [resolvable:$true] %s1806_s18 }
 0xb57   :  { %2322 = vmatprep.subr.mxu0 %v2524_v56  ;;  %2290 = vmatpush3.msra.mxu1 %v1452_v36  ;;  %s2484_s19 = scalar_lea.vmem %s1807_s18, 16  ;;  %s2488_s20 = scalar_lea.vmem %s1807_s18, 32 }
 0xb58   :  { %2323 = vmatpush3.msra.mxu0 %v1543_v37  ;;  %2291 = vmatprep.subr.mxu1 %v2524_v56  ;;  %p2485_p10 = scmp.ne.s32.totalorder %s1807_s18, %s2484_s19  ;;  %p2489_p11 = scmp.lt.s32.totalorder %s1807_s18, %s1807_s18 }
 0xb59   :  { %2324 = vmatprep.subr.mxu0 %v2524_v56  ;;  %2292 = vmatpush3.msra.mxu1 %v1451_v38  ;;  %p2490_p12 = scmp.lt.s32.totalorder %s2488_s20, %s2484_s19 }
 0xb5a   :  { %2325 = vmatpush3.msra.mxu0 %v1542_v39  ;;  %2293 = vmatprep.subr.mxu1 %v2524_v56 }
 0xb5b   :  { %2326 = vmatprep.subr.mxu0 %v2524_v56  ;;  %2294 = vmatpush3.msra.mxu1 %v1450_v40  ;;  %p2491_p13 = por %p2490_p12, %p2489_p11 }
 0xb5c   :  { %2327 = vmatpush3.msra.mxu0 %v1541_v41  ;;  %2295 = vmatprep.subr.mxu1 %v2524_v56 }
 0xb5d   :  { %2328 = vmatprep.subr.mxu0 %v2524_v56  ;;  %2296 = vmatpush3.msra.mxu1 %v1449_v34  ;;  %p2492_p0 = pnand %p2491_p13, %p2485_p10 }
 0xb5e   :  { %2329 = vmatpush3.msra.mxu0 %v1540_v42  ;;  %2297 = vmatprep.subr.mxu1 %v2524_v56 }
 0xb5f   :  { %2330 = vmatprep.subr.mxu0 %v2524_v56  ;;  %2298 = vmatpush3.msra.mxu1 %v1448_v43 }
 0xb60   :  { %2331 = vmatpush3.msra.mxu0 %v1539_v45  ;;  %2299 = vmatprep.subr.mxu1 %v2524_v56 }
 0xb61   :  { %2332 = vmatprep.subr.mxu0 %v2524_v56  ;;  %2300 = vmatpush3.msra.mxu1 %v1447_v47 }
 0xb62   :  { %2333 = vmatpush3.msra.mxu0 %v1538_v49  ;;  %2301 = vmatprep.subr.mxu1 %v2524_v56 }
 0xb63   :  { %2334 = vmatprep.subr.mxu0 %v2524_v56  ;;  %2302 = vmatpush3.msra.mxu1 %v1446_v52 }
 0xb64   :  { %2335 = vmatpush3.msra.mxu0 %v1537_v54  ;;  %2303 = vmatprep.subr.mxu1 %v2524_v56 }
 0xb65   :  { %2336 = vmatprep.subr.mxu0 %v2524_v56  ;;  %2304 = vmatpush3.msra.mxu1 %v1445_v55 }
 0xb66   :  { %2337 = vmatpush3.msra.mxu0 %v1536_v8  ;;  %2305 = vmatprep.subr.mxu1 %v2524_v56 }
 0xb67   :  { %2338 = vmatprep.subr.mxu0 %v2524_v56  ;;  %2306 = vmatpush3.msra.mxu1 %v1444_v59 }
 0xb68   :  { %2339 = vmatpush3.msra.mxu0 %v1535_v60  ;;  %2307 = vmatprep.subr.mxu1 %v2524_v56 }
 0xb69   :  { %2340 = vmatprep.subr.mxu0 %v2524_v56  ;;  %2308 = vmatpush3.msra.mxu1 %v1443_v48 }
 0xb6a   :  { %2341 = vmatpush3.msra.mxu0 %v1534_v50  ;;  %2309 = vmatprep.subr.mxu1 %v2524_v56 }
 0xb6b   :  { %2342 = vmatprep.subr.mxu0 %v2524_v56  ;;  %2310 = vmatpush3.msra.mxu1 %v1442_v51 }
 0xb6c   :  { %2343 = vmatpush3.msra.mxu0 %v1533_v13  ;;  %2311 = vmatprep.subr.mxu1 %v2524_v56 }
 0xb6d   :  { %2344 = vmatprep.subr.mxu0 %v2524_v56  ;;  %2312 = vmatpush3.msra.mxu1 %v1441_v61 }
 0xb6e   :  { %2313 = vmatprep.mubr.msk.f32.mxu1 %vm2525_vm1, %v2524_v56  ;;  %2345 = vmatpush3.msra.mxu0 %v1532_v62 }
 0xb6f   :  { %2314 = vmatmul.mubr.f32.vlgmr.msra.gmra.mxu1 %v1457_v63  ;;  %2346 = vmatprep.subr.mxu0 %v2524_v56 }
 0xb70   :  { %2351 = vmatprep.subr.mxu1 %v2524_v56  ;;  %2347 = vmatpush3.msra.mxu0 %v1531_v0 }
 0xb71   :  { %2348 = vmatprep.mubr.msk.f32.mxu0 %vm2525_vm1, %v2524_v56  ;;  %2352 = vmatpush3.msra.mxu1 %v1636_v1 }
 0xb72   :  { %2349 = vmatmul.mubr.f32.vlgmr.msra.gmra.mxu0 %v1547_v53  ;;  %2353 = vmatprep.subr.mxu1 %v2524_v56 }
 0xb73   :  { %2386 = vmatprep.subr.mxu0 %v2524_v56  ;;  %2354 = vmatpush3.msra.mxu1 %v1635_v2 }
 0xb74   :  { %2387 = vmatpush3.msra.mxu0 %v1724_v3  ;;  %2355 = vmatprep.subr.mxu1 %v2524_v56 }
 0xb75   :  { %2388 = vmatprep.subr.mxu0 %v2524_v56  ;;  %2356 = vmatpush3.msra.mxu1 %v1634_v57 }
 0xb76   :  { %2389 = vmatpush3.msra.mxu0 %v1723_v4  ;;  %2357 = vmatprep.subr.mxu1 %v2524_v56 }
 0xb77   :  { %2390 = vmatprep.subr.mxu0 %v2524_v56  ;;  %2358 = vmatpush3.msra.mxu1 %v1633_v5 }
 0xb78   :  { %2391 = vmatpush3.msra.mxu0 %v1722_v22  ;;  %2359 = vmatprep.subr.mxu1 %v2524_v56 }
 0xb79   :  { %2392 = vmatprep.subr.mxu0 %v2524_v56  ;;  %2360 = vmatpush3.msra.mxu1 %v1632_v46 }
 0xb7a   :  { %2393 = vmatpush3.msra.mxu0 %v1721_v6  ;;  %2361 = vmatprep.subr.mxu1 %v2524_v56 }
 0xb7b   :  { %2394 = vmatprep.subr.mxu0 %v2524_v56  ;;  %2362 = vmatpush3.msra.mxu1 %v1631_v58 }
 0xb7c   :  { %2395 = vmatpush3.msra.mxu0 %v1720_v7  ;;  %2363 = vmatprep.subr.mxu1 %v2524_v56 }
 0xb7d   :  { %2396 = vmatprep.subr.mxu0 %v2524_v56  ;;  %2364 = vmatpush3.msra.mxu1 %v1630_v9 }
 0xb7e   :  { %2397 = vmatpush3.msra.mxu0 %v1719_v10  ;;  %2365 = vmatprep.subr.mxu1 %v2524_v56 }
 0xb7f   :  { %2398 = vmatprep.subr.mxu0 %v2524_v56  ;;  %2366 = vmatpush3.msra.mxu1 %v1629_v11 }
 0xb80   :  { %2399 = vmatpush3.msra.mxu0 %v1718_v12  ;;  %2367 = vmatprep.subr.mxu1 %v2524_v56 }
 0xb81   :  { %2400 = vmatprep.subr.mxu0 %v2524_v56  ;;  %2368 = vmatpush3.msra.mxu1 %v1628_v14 }
 0xb82   :  { %2401 = vmatpush3.msra.mxu0 %v1717_v15  ;;  %2369 = vmatprep.subr.mxu1 %v2524_v56 }
 0xb83   :  { %2402 = vmatprep.subr.mxu0 %v2524_v56  ;;  %2370 = vmatpush3.msra.mxu1 %v1627_v16 }
 0xb84   :  { %2403 = vmatpush3.msra.mxu0 %v1716_v18  ;;  %2371 = vmatprep.subr.mxu1 %v2524_v56 }
 0xb85   :  { %2404 = vmatprep.subr.mxu0 %v2524_v56  ;;  %2372 = vmatpush3.msra.mxu1 %v1626_v19 }
 0xb86   :  { %2405 = vmatpush3.msra.mxu0 %v1715_v21  ;;  %2373 = vmatprep.subr.mxu1 %v2524_v56 }
 0xb87   :  { %2406 = vmatprep.subr.mxu0 %v2524_v56  ;;  %2374 = vmatpush3.msra.mxu1 %v1625_v23 }
 0xb88   :  { %2407 = vmatpush3.msra.mxu0 %v1714_v24  ;;  %2375 = vmatprep.subr.mxu1 %v2524_v56 }
 0xb89   :  { %2408 = vmatprep.subr.mxu0 %v2524_v56  ;;  %2376 = vmatpush3.msra.mxu1 %v1624_v25 }
 0xb8a   :  { %2409 = vmatpush3.msra.mxu0 %v1713_v26  ;;  %2377 = vmatprep.subr.mxu1 %v2524_v56 }
 0xb8b   :  { %2410 = vmatprep.subr.mxu0 %v2524_v56  ;;  %2378 = vmatpush3.msra.mxu1 %v1623_v27 }
 0xb8c   :  { %2411 = vmatpush3.msra.mxu0 %v1712_v28  ;;  %2379 = vmatprep.subr.mxu1 %v2524_v56 }
 0xb8d   :  { %2412 = vmatprep.subr.mxu0 %v2524_v56  ;;  %2380 = vmatpush3.msra.mxu1 %v1622_v29 }
 0xb8e   :  { %2413 = vmatpush3.msra.mxu0 %v1711_v17  ;;  %2381 = vmatprep.subr.mxu1 %v2524_v56 }
 0xb8f   :  { %2414 = vmatprep.subr.mxu0 %v2524_v56  ;;  %2382 = vmatpush3.msra.mxu1 %v1621_v30 }
 0xb90   :  { %2383 = vmatprep.mubr.msk.f32.mxu1 %vm2525_vm1, %v2524_v56  ;;  %2415 = vmatpush3.msra.mxu0 %v1710_v31 }
 0xb91   :  { %2384 = vmatmul.mubr.f32.vlgmr.msra.gmra.mxu1 %v2944_v20  ;;  %2416 = vmatprep.subr.mxu0 %v2524_v56 }
 0xb92   :  { %2417 = vmatpush3.msra.mxu0 %v1709_v32  ;;  %2418 = vmatprep.mubr.msk.f32.mxu0 %vm2525_vm1, %v2524_v56 }
 0xb93   :  { %2419 = vmatmul.mubr.f32.vlgmr.msra.gmra.mxu0 %v1726_v44 }
 0xbcb   :  { %v984_v35 = vpop.f32.mrf.mxu1 }
 0xbcc   :  { %v988_v36 = vadd.f32 %v984_v35, %v901_v33 }
 0xbcd   :  { %v2105_v37 = vpop.f32.mrf.mxu1  ;;  %v1075_v38 = vpop.f32.mrf.mxu0 }
 0xbce   :  { %v1079_v39 = vadd.f32 %v1075_v38, %v988_v36 }
 0xbcf   :  { %v2140_v40 = vpop.f32.mrf.mxu0 }
 0xbeb   :  { %v1165_v41 = vpop.f32.mrf.mxu1 }
 0xbec   :  { %v1169_v34 = vadd.f32 %v1165_v41, %v1079_v39 }
 0xbed   :  { %v2175_v20 = vpop.f32.mrf.mxu1 }
 0xbee   :  { %v1255_v42 = vpop.f32.mrf.mxu0 }
 0xbef   :  { %v1259_v43 = vadd.f32 %v1255_v42, %v1169_v34 }
 0xbf0   :  { %v2210_v45 = vpop.f32.mrf.mxu0 }
 0xc0d   :  { %v1345_v47 = vpop.f32.mrf.mxu1 }
 0xc0e   :  { %v1349_v60 = vadd.f32 %v1345_v47, %v1259_v43 }
 0xc0f   :  { %v2245_v49 = vpop.f32.mrf.mxu1 }
 0xc10   :  { %v1435_v56 = vpop.f32.mrf.mxu0 }
 0xc11   :  { %v1439_v48 = vadd.f32 %v1435_v56, %v1349_v60 }
 0xc12   :  { %v2280_v52 = vpop.f32.mrf.mxu0 }
 0xc2f   :  { %v1525_v54 = vpop.f32.mrf.mxu1 }
 0xc30   :  { %v1529_v50 = vadd.f32 %v1525_v54, %v1439_v48 }
 0xc31   :  { %v2315_v55 = vpop.f32.mrf.mxu1 }
 0xc32   :  { %v1615_v8 = vpop.f32.mrf.mxu0 }
 0xc33   :  { %v1619_v51 = vadd.f32 %v1615_v8, %v1529_v50 }
 0xc34   :  { %v2350_v59 = vpop.f32.mrf.mxu0 }
 0xc51   :  { %v1703_v13 = vpop.f32.mrf.mxu1 }
 0xc52   :  { %v1707_v61 = vadd.f32 %v1703_v13, %v1619_v51 }
 0xc53   :  { %v2385_v62 = vpop.f32.mrf.mxu1  ;;  %v1794_v63 = vpop.f32.mrf.mxu0 }
 0xc54   :  { %v1798_v0 = vadd.f32 %v1794_v63, %v1707_v61 }
 0xc55   :  { %v2420_v1 = vpop.f32.mrf.mxu0 }
 0xc56   :  { %1799 = vst [vmem:[#allocation7] sm:$0x1] %v1798_v0 }
 0xc57   :  { %2495 = shalt.err (!%p2492_p0)
}
 0xc58   :  { %1809 = dma.vmem_to_hbm [thread:$0]  %s1807_s18, 16, %s3114_s8, [#allocation4]  }
 0xc59   :  { %2508 = dma.done.wait [#allocation4], 16  }
 0xc5a   :  { %2509 = vsyncadd [#allocation4], 4294967280 }
 0xc5b   :  { %1813 = vsyncpa [#allocation3], 1 }
 0xc5c   :  { %1814 = vsyncpa [#allocation6], 1 }
 0xc5d   :  { %1815 = vsyncpa [#allocation4], 1 }

</bundles_post_ra>
